<compile_context>
chip_gen: v7x
topology: tpu7x:2x2x1
jax: 0.10.0
libtpu: 0.0.40
codegen_flags: <defaults>
</compile_context>

<pallas_src>
import functools

import jax
import jax.numpy as jnp
from jax.experimental import pallas as pl
from jax.experimental.pallas import tpu as pltpu

IN_FEATURES = 28 * 28      # 784
IN_PADDED = 896            # 7 * 128, lane-aligned K for the first matmul
HIDDEN = 512
OUT_FEATURES = 10
OUT_PADDED = 128           # lane-dense output block; slice [:, :10] in the wrapper


def _round_up(n, m):
    return ((n + m - 1) // m) * m


def mlp_kernel(x_ref, w1_ref, b1_ref, w2_ref, b2_ref, w3_ref, b3_ref, o_ref):
    # bf16 operands on the MXU, f32 accumulation + bias/ReLU on the VPU.
    x = x_ref[...]                                                            # (TB, 896) bf16
    h1 = jnp.dot(x, w1_ref[...], preferred_element_type=jnp.float32) + b1_ref[...]
    h1 = jnp.maximum(h1, 0.0).astype(jnp.bfloat16)                            # (TB, 512)
    h2 = jnp.dot(h1, w2_ref[...], preferred_element_type=jnp.float32) + b2_ref[...]
    h2 = jnp.maximum(h2, 0.0).astype(jnp.bfloat16)                            # (TB, 512)
    logits = jnp.dot(h2, w3_ref[...], preferred_element_type=jnp.float32) + b3_ref[...]
    o_ref[...] = logits                                                       # (TB, 128) f32


def prepare_params(params):
    """Pad/cast (in, out)-layout f32 params into the kernel layout once:
    bf16 weights (K padded 784->896 on layer 1, N padded 10->128 on layer 3),
    f32 biases with matching padding."""
    w1, b1, w2, b2, w3, b3 = params
    w1p = jnp.zeros((IN_PADDED, HIDDEN), jnp.float32).at[:IN_FEATURES, :].set(w1)
    w3p = jnp.zeros((HIDDEN, OUT_PADDED), jnp.float32).at[:, :OUT_FEATURES].set(w3)
    b3p = jnp.zeros((1, OUT_PADDED), jnp.float32).at[:, :OUT_FEATURES].set(b3)
    return (
        w1p.astype(jnp.bfloat16), b1.astype(jnp.float32),
        w2.astype(jnp.bfloat16), b2.astype(jnp.float32),
        w3p.astype(jnp.bfloat16), b3p,
    )


@functools.partial(jax.jit, static_argnames=("tile_b",))
def neural_network_forward(x, prepared_params, tile_b=512):
    """x: (B, 1, 28, 28) or (B, 28, 28). Returns f32 logits (B, 10)."""
    w1, b1, w2, b2, w3, b3 = prepared_params
    B = x.shape[0]
    x_flat = x.reshape(B, -1)                      # nn.Flatten()
    assert x_flat.shape[1] == IN_FEATURES

    # Batch tile: multiple of 8 sublanes, capped at tile_b; pad the batch tail with zeros.
    TB = min(tile_b, _round_up(B, 8))
    B_pad = _round_up(B, TB)
    x_pad = (
        jnp.zeros((B_pad, IN_PADDED), jnp.bfloat16)
        .at[:B, :IN_FEATURES]
        .set(x_flat.astype(jnp.bfloat16))
    )

    grid = (B_pad // TB,)

    flops = 2 * B_pad * (IN_PADDED * HIDDEN + HIDDEN * HIDDEN + HIDDEN * OUT_PADDED)
    bytes_accessed = (
        x_pad.size * 2
        + (w1.size + w2.size + w3.size) * 2
        + (b1.size + b2.size + b3.size) * 4
        + B_pad * OUT_PADDED * 4
    )

    out = pl.pallas_call(
        mlp_kernel,
        out_shape=jax.ShapeDtypeStruct((B_pad, OUT_PADDED), jnp.float32),
        grid=grid,
        in_specs=[
            pl.BlockSpec((TB, IN_PADDED), lambda i: (i, 0)),       # activations: tiled over batch
            pl.BlockSpec((IN_PADDED, HIDDEN), lambda i: (0, 0)),   # weights/biases: VMEM-resident
            pl.BlockSpec((1, HIDDEN), lambda i: (0, 0)),
            pl.BlockSpec((HIDDEN, HIDDEN), lambda i: (0, 0)),
            pl.BlockSpec((1, HIDDEN), lambda i: (0, 0)),
            pl.BlockSpec((HIDDEN, OUT_PADDED), lambda i: (0, 0)),
            pl.BlockSpec((1, OUT_PADDED), lambda i: (0, 0)),
        ],
        out_specs=pl.BlockSpec((TB, OUT_PADDED), lambda i: (i, 0)),
        compiler_params=pltpu.CompilerParams(
            dimension_semantics=("parallel",),    # shard batch steps across v7x's 2 TCs
            vmem_limit_bytes=32 << 20,            # real footprint is ~6 MB; leave headroom
        ),
        cost_estimate=pl.CostEstimate(
            flops=flops, bytes_accessed=bytes_accessed, transcendentals=0
        ),
    )(x_pad, w1, b1, w2, b2, w3, b3)

    return out[:B, :OUT_FEATURES]


def init_params(key):
    """Deterministic init matching nn.Linear shapes, stored (in, out) so y = x @ W + b."""
    k1, k2, k3 = jax.random.split(key, 3)

    def linear(k, fan_in, fan_out):
        bound = 1.0 / jnp.sqrt(fan_in)
        kw, kb = jax.random.split(k)
        w = jax.random.uniform(kw, (fan_in, fan_out), jnp.float32, -bound, bound)
        b = jax.random.uniform(kb, (1, fan_out), jnp.float32, -bound, bound)
        return w, b

    w1, b1 = linear(k1, IN_FEATURES, HIDDEN)
    w2, b2 = linear(k2, HIDDEN, HIDDEN)
    w3, b3 = linear(k3, HIDDEN, OUT_FEATURES)
    return (w1, b1, w2, b2, w3, b3)


def reference_forward(x, params):
    w1, b1, w2, b2, w3, b3 = params
    x = x.reshape(x.shape[0], -1)
    h1 = jnp.maximum(x @ w1 + b1, 0.0)
    h2 = jnp.maximum(h1 @ w2 + b2, 0.0)
    return h2 @ w3 + b3


if __name__ == "__main__":
    key = jax.random.PRNGKey(0)
    kx, kp = jax.random.split(key)

    B = 8
    x = jax.random.normal(kx, (B, 1, 28, 28), jnp.float32)  # NCHW, like MNIST batches
    params = init_params(kp)
    prepared = prepare_params(params)

    logits = neural_network_forward(x, prepared)
    jax.block_until_ready(logits)

    ref = reference_forward(x, params)  # full f32 reference
    assert logits.shape == (B, OUT_FEATURES)
    # bf16 matmul operands (f32 accumulation) -> loosened tolerance vs the f32 reference.
    assert jnp.allclose(logits, ref, atol=3e-2, rtol=3e-2)

    print("KERNEL_OK")
</pallas_src>

<mosaic_0001>
module attributes {stable_mosaic.version = 11 : i64} {
  func.func @mlp_kernel(%arg0: i32, %arg1: memref<8x896xbf16, #tpu.memory_space<vmem>>, %arg2: memref<896x512xbf16, #tpu.memory_space<vmem>>, %arg3: memref<1x512xf32, #tpu.memory_space<vmem>>, %arg4: memref<512x512xbf16, #tpu.memory_space<vmem>>, %arg5: memref<1x512xf32, #tpu.memory_space<vmem>>, %arg6: memref<512x128xbf16, #tpu.memory_space<vmem>>, %arg7: memref<1x128xf32, #tpu.memory_space<vmem>>, %arg8: memref<8x128xf32, #tpu.memory_space<vmem>>) attributes {dimension_semantics = [#tpu.dimension_semantics<parallel>], iteration_bounds = array<i64: 1>, scalar_prefetch = 0 : i64, scratch_operands = 0 : i64, tpu.core_type = #tpu.core_type<tc>, window_params = [{transform_indices = @transform_0, window_bounds = array<i64: 8, 896>}, {pipeline_mode = #tpu.pipeline_mode<synchronous>, transform_indices = @transform_1, window_bounds = array<i64: 896, 512>}, {pipeline_mode = #tpu.pipeline_mode<synchronous>, transform_indices = @transform_2, window_bounds = array<i64: 1, 512>}, {pipeline_mode = #tpu.pipeline_mode<synchronous>, transform_indices = @transform_3, window_bounds = array<i64: 512, 512>}, {pipeline_mode = #tpu.pipeline_mode<synchronous>, transform_indices = @transform_4, window_bounds = array<i64: 1, 512>}, {pipeline_mode = #tpu.pipeline_mode<synchronous>, transform_indices = @transform_5, window_bounds = array<i64: 512, 128>}, {pipeline_mode = #tpu.pipeline_mode<synchronous>, transform_indices = @transform_6, window_bounds = array<i64: 1, 128>}, {transform_indices = @transform_7, window_bounds = array<i64: 8, 128>}]} {
    %c0 = arith.constant 0 : index
    %c0_0 = arith.constant 0 : index
    %0 = vector.load %arg1[%c0, %c0_0] : memref<8x896xbf16, #tpu.memory_space<vmem>>, vector<8x896xbf16>
    %c0_1 = arith.constant 0 : index
    %c0_2 = arith.constant 0 : index
    %1 = vector.load %arg2[%c0_1, %c0_2] : memref<896x512xbf16, #tpu.memory_space<vmem>>, vector<896x512xbf16>
    %cst = arith.constant dense<0.000000e+00> : vector<8x512xf32>
    %2 = tpu.matmul %0, %1, %cst {dimension_numbers = #tpu.dot_dimension_numbers<[1], [0], [0], [1], [0, 0, 1, 1], [], []>} : vector<8x896xbf16>, vector<896x512xbf16>, vector<8x512xf32> -> vector<8x512xf32>
    %c0_3 = arith.constant 0 : index
    %c0_4 = arith.constant 0 : index
    %3 = vector.load %arg3[%c0_3, %c0_4] : memref<1x512xf32, #tpu.memory_space<vmem>>, vector<1x512xf32>
    %4 = vector.broadcast %3 : vector<1x512xf32> to vector<8x512xf32>
    %5 = arith.addf %2, %4 : vector<8x512xf32>
    %cst_5 = arith.constant 0.000000e+00 : f32
    %6 = vector.broadcast %cst_5 : f32 to vector<8x512xf32>
    %7 = arith.maximumf %5, %6 : vector<8x512xf32>
    %8 = arith.truncf %7 : vector<8x512xf32> to vector<8x512xbf16>
    %c0_6 = arith.constant 0 : index
    %c0_7 = arith.constant 0 : index
    %9 = vector.load %arg4[%c0_6, %c0_7] : memref<512x512xbf16, #tpu.memory_space<vmem>>, vector<512x512xbf16>
    %cst_8 = arith.constant dense<0.000000e+00> : vector<8x512xf32>
    %10 = tpu.matmul %8, %9, %cst_8 {dimension_numbers = #tpu.dot_dimension_numbers<[1], [0], [0], [1], [0, 0, 1, 1], [], []>} : vector<8x512xbf16>, vector<512x512xbf16>, vector<8x512xf32> -> vector<8x512xf32>
    %c0_9 = arith.constant 0 : index
    %c0_10 = arith.constant 0 : index
    %11 = vector.load %arg5[%c0_9, %c0_10] : memref<1x512xf32, #tpu.memory_space<vmem>>, vector<1x512xf32>
    %12 = vector.broadcast %11 : vector<1x512xf32> to vector<8x512xf32>
    %13 = arith.addf %10, %12 : vector<8x512xf32>
    %cst_11 = arith.constant 0.000000e+00 : f32
    %14 = vector.broadcast %cst_11 : f32 to vector<8x512xf32>
    %15 = arith.maximumf %13, %14 : vector<8x512xf32>
    %16 = arith.truncf %15 : vector<8x512xf32> to vector<8x512xbf16>
    %c0_12 = arith.constant 0 : index
    %c0_13 = arith.constant 0 : index
    %17 = vector.load %arg6[%c0_12, %c0_13] : memref<512x128xbf16, #tpu.memory_space<vmem>>, vector<512x128xbf16>
    %cst_14 = arith.constant dense<0.000000e+00> : vector<8x128xf32>
    %18 = tpu.matmul %16, %17, %cst_14 {dimension_numbers = #tpu.dot_dimension_numbers<[1], [0], [0], [1], [0, 0, 1, 1], [], []>} : vector<8x512xbf16>, vector<512x128xbf16>, vector<8x128xf32> -> vector<8x128xf32>
    %c0_15 = arith.constant 0 : index
    %c0_16 = arith.constant 0 : index
    %19 = vector.load %arg7[%c0_15, %c0_16] : memref<1x128xf32, #tpu.memory_space<vmem>>, vector<1x128xf32>
    %20 = vector.broadcast %19 : vector<1x128xf32> to vector<8x128xf32>
    %21 = arith.addf %18, %20 : vector<8x128xf32>
    %c0_17 = arith.constant 0 : index
    %c0_18 = arith.constant 0 : index
    %22 = vector.load %arg8[%c0_17, %c0_18] : memref<8x128xf32, #tpu.memory_space<vmem>>, vector<8x128xf32>
    tpu.vector_store %arg8[%c0_17, %c0_18], %21 {strides = array<i32>} : memref<8x128xf32, #tpu.memory_space<vmem>>, vector<8x128xf32>,
    return
  }
  func.func @transform_0(%arg0: i32) -> (i32, i32) {
    %c0_i32 = arith.constant 0 : i32
    %c0_i32_0 = arith.constant 0 : i32
    return %arg0, %c0_i32 : i32, i32
  }
  func.func @transform_1(%arg0: i32) -> (i32, i32) {
    %c0_i32 = arith.constant 0 : i32
    %c0_i32_0 = arith.constant 0 : i32
    %c0_i32_1 = arith.constant 0 : i32
    return %c0_i32, %c0_i32_0 : i32, i32
  }
  func.func @transform_2(%arg0: i32) -> (i32, i32) {
    %c0_i32 = arith.constant 0 : i32
    %c0_i32_0 = arith.constant 0 : i32
    %c0_i32_1 = arith.constant 0 : i32
    return %c0_i32, %c0_i32_0 : i32, i32
  }
  func.func @transform_3(%arg0: i32) -> (i32, i32) {
    %c0_i32 = arith.constant 0 : i32
    %c0_i32_0 = arith.constant 0 : i32
    %c0_i32_1 = arith.constant 0 : i32
    return %c0_i32, %c0_i32_0 : i32, i32
  }
  func.func @transform_4(%arg0: i32) -> (i32, i32) {
    %c0_i32 = arith.constant 0 : i32
    %c0_i32_0 = arith.constant 0 : i32
    %c0_i32_1 = arith.constant 0 : i32
    return %c0_i32, %c0_i32_0 : i32, i32
  }
  func.func @transform_5(%arg0: i32) -> (i32, i32) {
    %c0_i32 = arith.constant 0 : i32
    %c0_i32_0 = arith.constant 0 : i32
    %c0_i32_1 = arith.constant 0 : i32
    return %c0_i32, %c0_i32_0 : i32, i32
  }
  func.func @transform_6(%arg0: i32) -> (i32, i32) {
    %c0_i32 = arith.constant 0 : i32
    %c0_i32_0 = arith.constant 0 : i32
    %c0_i32_1 = arith.constant 0 : i32
    return %c0_i32, %c0_i32_0 : i32, i32
  }
  func.func @transform_7(%arg0: i32) -> (i32, i32) {
    %c0_i32 = arith.constant 0 : i32
    %c0_i32_0 = arith.constant 0 : i32
    return %arg0, %c0_i32 : i32, i32
  }
}

</mosaic_0001>

<bundles_post_ra>
// kernel: neural_network_forward.1
= control target key start
LH: loop header
LB: loop body
LE: loop exit
PB: predicated region body
PF: predicated region fallthrough
CT: control target
= control target key end

     0   :  { %12 = vsyncpa [#allocation3], 0  ;;  %s4472_s0 = inlined_call_operand.vmem [shape: bf16[8,896], index: 0, kind: input, shape index: {}]   ;;  %s4473_s1 = inlined_call_operand.hbm [shape: bf16[896,512], index: 1, kind: input, shape index: {}]   ;;  %s4474_s2 = inlined_call_operand.vmem [shape: f32[1,512], index: 2, kind: input, shape index: {}]   ;;  %s4475_s3 = inlined_call_operand.hbm [shape: bf16[512,512], index: 3, kind: input, shape index: {}]   ;;  %s4476_s4 = inlined_call_operand.vmem [shape: f32[1,512], index: 4, kind: input, shape index: {}]   ;;  %s4477_s5 = inlined_call_operand.vmem [shape: bf16[512,128], index: 5, kind: input, shape index: {}]   ;;  %s4478_s6 = inlined_call_operand.vmem [shape: f32[1,128], index: 6, kind: input, shape index: {}]   ;;  %s4479_s7 = inlined_call_operand.hbm [shape: f32[8,128], index: 7, kind: output, shape index: {}]  }
   0x1   :  { %13 = vsyncpa [#allocation6], 0 }
   0x2   :  { %14 = vsyncpa [#allocation4], 0  ;;  %s4230_s24 = smov [#allocation2]   ;;  %s4158_s28 = scalar_lea.hbm %s4473_s1, 28672 }
   0x3   :  { %s22_s25 = sshll.u32 %s4230_s24, 4  ;;  %p4159_p0 = scmp.ne.s32.totalorder %s4473_s1, %s4158_s28  ;;  %s23_s25 = int_to_ptr.vmem [resolvable:$true] %s22_s25 }
   0x4   :  { %p4162_p1 = scmp.lt.u32.totalorder %s4158_s28, %s4473_s1 }
   0x6   :  { %p4164_p2 = pnand %p4162_p1, %p4159_p0 }
   0x8   :  { %4167 = shalt.err (!%p4164_p2)
}
   0x9   :  { %s4168_s10 = scalar_lea.vmem %s23_s25, 28672  ;;  %p4173_p4 = scmp.lt.s32.totalorder %s23_s25, %s23_s25 }
   0xa   :  { %p4169_p3 = scmp.ne.s32.totalorder %s23_s25, %s4168_s10  ;;  %p4174_p5 = scmp.lt.s32.totalorder %s4168_s10, %s4168_s10 }
   0xc   :  { %p4175_p6 = por %p4174_p5, %p4173_p4 }
   0xe   :  { %p4176_p7 = pnand %p4175_p6, %p4169_p3 }
  0x10   :  { %4179 = shalt.err (!%p4176_p7)
}
  0x11   :  { %s4231_s11 = smov 256   ;;  %s4232_s12 = smov 16  }
  0x12   :  { %28 = dma.hbm_to_vmem [thread:$0]  %s4473_s1, 28672, %s23_s25, [#allocation3], %s4231_s11, %s4231_s11, %s4232_s12  }
  0x13   :  { %s4233_s15 = smov [#allocation5]   ;;  %s4180_s19 = scalar_lea.hbm %s4475_s3, 16384 }
  0x14   :  { %s36_s16 = sshll.u32 %s4233_s15, 4  ;;  %p4181_p8 = scmp.ne.s32.totalorder %s4475_s3, %s4180_s19  ;;  %s37_s16 = int_to_ptr.vmem [resolvable:$true] %s36_s16 }
  0x15   :  { %p4184_p9 = scmp.lt.u32.totalorder %s4180_s19, %s4475_s3 }
  0x17   :  { %p4186_p10 = pnand %p4184_p9, %p4181_p8 }
  0x19   :  { %4189 = shalt.err (!%p4186_p10)
}
  0x1a   :  { %s4190_s24 = scalar_lea.vmem %s37_s16, 16384  ;;  %p4195_p12 = scmp.lt.s32.totalorder %s37_s16, %s37_s16 }
  0x1b   :  { %p4191_p11 = scmp.ne.s32.totalorder %s37_s16, %s4190_s24  ;;  %p4196_p13 = scmp.lt.s32.totalorder %s4190_s24, %s4190_s24 }
  0x1d   :  { %p4197_p0 = por %p4196_p13, %p4195_p12 }
  0x1f   :  { %p4198_p1 = pnand %p4197_p0, %p4191_p11 }
  0x21   :  { %4201 = shalt.err (!%p4198_p1)
}
  0x22   :  { %42 = dma.hbm_to_vmem [thread:$0]  %s4475_s3, 16384, %s37_s16, [#allocation6], %s4231_s11, %s4231_s11, %s4232_s12  }
  0x23   :  { %4224 = dma.done.wait [#allocation3], 28672  }
  0x24   :  { %4225 = vsyncadd [#allocation3], 4294938624 }
  0x25   :  { %4226 = dma.done.wait [#allocation6], 16384  }
  0x26   :  { %4227 = vsyncadd [#allocation6], 4294950912  ;;  %v3591_v0 = vld [vmem:[#allocation2 + $0x4] ss:$16 sps:$4 sm:$0xff]   ;;  %v3593_v1 = vld [vmem:[#allocation2 + $0xc] ss:$16 sps:$4 sm:$0xff]  }
  0x27   :  { %1451 = vmatprep.subr.bf16.mxu0 %v3591_v0  ;;  %v3595_v2 = vld [vmem:[#allocation2] ss:$16 sps:$4 sm:$0xff]   ;;  %v3596_v3 = vld [vmem:[#allocation2 + $0x8] ss:$16 sps:$4 sm:$0xff]   ;;  %1615 = vmatprep.subr.bf16.mxu1 %v3593_v1  ;;  %v3597_v4 = vld [vmem:[#allocation2 + $0x24] ss:$16 sps:$4 sm:$0xff]  }
  0x28   :  { %1452 = vmatpush1.bf16.msra.mxu0 %v3595_v2  ;;  %1616 = vmatpush1.bf16.msra.mxu1 %v3596_v3  ;;  %v3599_v5 = vld [vmem:[#allocation2 + $0x2c] ss:$16 sps:$4 sm:$0xff]   ;;  %v3601_v6 = vld [vmem:[#allocation2 + $0x20] ss:$16 sps:$4 sm:$0xff]   ;;  %v3602_v7 = vld [vmem:[#allocation2 + $0x28] ss:$16 sps:$4 sm:$0xff]  }
  0x29   :  { %1453 = vmatprep.subr.bf16.mxu0 %v3597_v4  ;;  %1617 = vmatprep.subr.bf16.mxu1 %v3599_v5  ;;  %v3603_v8 = vld [vmem:[#allocation2 + $0x44] ss:$16 sps:$4 sm:$0xff]   ;;  %v3605_v9 = vld [vmem:[#allocation2 + $0x4c] ss:$16 sps:$4 sm:$0xff]   ;;  %v3607_v10 = vld [vmem:[#allocation2 + $0x40] ss:$16 sps:$4 sm:$0xff]  }
  0x2a   :  { %v3608_v11 = vld [vmem:[#allocation2 + $0x48] ss:$16 sps:$4 sm:$0xff]   ;;  %v3609_v12 = vld [vmem:[#allocation2 + $0x64] ss:$16 sps:$4 sm:$0xff]   ;;  %v3611_v13 = vld [vmem:[#allocation2 + $0x6c] ss:$16 sps:$4 sm:$0xff]  }
  0x2b   :  { %v3613_v14 = vld [vmem:[#allocation2 + $0x60] ss:$16 sps:$4 sm:$0xff]   ;;  %v3614_v15 = vld [vmem:[#allocation2 + $0x68] ss:$16 sps:$4 sm:$0xff]   ;;  %v3615_v16 = vld [vmem:[#allocation2 + $0x84] ss:$16 sps:$4 sm:$0xff]  }
  0x2c   :  { %1454 = vmatpush1.bf16.msra.mxu0 %v3601_v6  ;;  %1618 = vmatpush1.bf16.msra.mxu1 %v3602_v7  ;;  %v3617_v17 = vld [vmem:[#allocation2 + $0x8c] ss:$16 sps:$4 sm:$0xff]   ;;  %v3619_v18 = vld [vmem:[#allocation2 + $0x80] ss:$16 sps:$4 sm:$0xff]   ;;  %v3620_v19 = vld [vmem:[#allocation2 + $0x88] ss:$16 sps:$4 sm:$0xff]  }
  0x2d   :  { %1455 = vmatprep.subr.bf16.mxu0 %v3603_v8  ;;  %1619 = vmatprep.subr.bf16.mxu1 %v3605_v9  ;;  %v3621_v20 = vld [vmem:[#allocation2 + $0xa4] ss:$16 sps:$4 sm:$0xff]   ;;  %v3623_v21 = vld [vmem:[#allocation2 + $0xac] ss:$16 sps:$4 sm:$0xff]   ;;  %v3625_v22 = vld [vmem:[#allocation2 + $0xa0] ss:$16 sps:$4 sm:$0xff]  }
  0x2e   :  { %v3626_v23 = vld [vmem:[#allocation2 + $0xa8] ss:$16 sps:$4 sm:$0xff]   ;;  %v3627_v24 = vld [vmem:[#allocation2 + $0xc4] ss:$16 sps:$4 sm:$0xff]   ;;  %v3629_v25 = vld [vmem:[#allocation2 + $0xcc] ss:$16 sps:$4 sm:$0xff]  }
  0x2f   :  { %v3631_v26 = vld [vmem:[#allocation2 + $0xc0] ss:$16 sps:$4 sm:$0xff]   ;;  %v3632_v27 = vld [vmem:[#allocation2 + $0xc8] ss:$16 sps:$4 sm:$0xff]   ;;  %v3633_v28 = vld [vmem:[#allocation2 + $0xe4] ss:$16 sps:$4 sm:$0xff]  }
  0x30   :  { %1456 = vmatpush1.bf16.msra.mxu0 %v3607_v10  ;;  %1620 = vmatpush1.bf16.msra.mxu1 %v3608_v11  ;;  %v3635_v29 = vld [vmem:[#allocation2 + $0xec] ss:$16 sps:$4 sm:$0xff]   ;;  %v3637_v30 = vld [vmem:[#allocation2 + $0xe0] ss:$16 sps:$4 sm:$0xff]   ;;  %v3638_v31 = vld [vmem:[#allocation2 + $0xe8] ss:$16 sps:$4 sm:$0xff]  }
  0x31   :  { %1457 = vmatprep.subr.bf16.mxu0 %v3609_v12  ;;  %1621 = vmatprep.subr.bf16.mxu1 %v3611_v13  ;;  %v3639_v32 = vld [vmem:[#allocation2 + $0x104] ss:$16 sps:$4 sm:$0xff]   ;;  %v3641_v33 = vld [vmem:[#allocation2 + $0x10c] ss:$16 sps:$4 sm:$0xff]   ;;  %v3643_v34 = vld [vmem:[#allocation2 + $0x100] ss:$16 sps:$4 sm:$0xff]  }
  0x32   :  { %v3644_v35 = vld [vmem:[#allocation2 + $0x108] ss:$16 sps:$4 sm:$0xff]   ;;  %v3645_v36 = vld [vmem:[#allocation2 + $0x124] ss:$16 sps:$4 sm:$0xff]   ;;  %v3647_v37 = vld [vmem:[#allocation2 + $0x12c] ss:$16 sps:$4 sm:$0xff]  }
  0x33   :  { %v3649_v38 = vld [vmem:[#allocation2 + $0x120] ss:$16 sps:$4 sm:$0xff]   ;;  %v3650_v39 = vld [vmem:[#allocation2 + $0x128] ss:$16 sps:$4 sm:$0xff]   ;;  %v3651_v40 = vld [vmem:[#allocation2 + $0x144] ss:$16 sps:$4 sm:$0xff]  }
  0x34   :  { %1458 = vmatpush1.bf16.msra.mxu0 %v3613_v14  ;;  %1622 = vmatpush1.bf16.msra.mxu1 %v3614_v15  ;;  %v3653_v41 = vld [vmem:[#allocation2 + $0x14c] ss:$16 sps:$4 sm:$0xff]   ;;  %v3655_v42 = vld [vmem:[#allocation2 + $0x140] ss:$16 sps:$4 sm:$0xff]   ;;  %v3656_v43 = vld [vmem:[#allocation2 + $0x148] ss:$16 sps:$4 sm:$0xff]  }
  0x35   :  { %1459 = vmatprep.subr.bf16.mxu0 %v3615_v16  ;;  %1623 = vmatprep.subr.bf16.mxu1 %v3617_v17  ;;  %v3657_v44 = vld [vmem:[#allocation2 + $0x164] ss:$16 sps:$4 sm:$0xff]   ;;  %v3659_v45 = vld [vmem:[#allocation2 + $0x16c] ss:$16 sps:$4 sm:$0xff]   ;;  %v3661_v47 = vld [vmem:[#allocation2 + $0x160] ss:$16 sps:$4 sm:$0xff]  }
  0x36   :  { %v56_v46 = vld [vmem:[%s4472_s0] sm:$0xff]  ;;  %v3662_v49 = vld [vmem:[#allocation2 + $0x168] ss:$16 sps:$4 sm:$0xff]   ;;  %v3665_v51 = vld [vmem:[#allocation2 + $0x18c] ss:$16 sps:$4 sm:$0xff]   ;;  %s4235_s22 = smov [#allocation7]  }
  0x37   :  { %v3110_v48 = vcombine.high %v56_v46, %v56_v46  ;;  %v3663_v50 = vld [vmem:[#allocation2 + $0x184] ss:$16 sps:$4 sm:$0xff]   ;;  %v3667_v52 = vld [vmem:[#allocation2 + $0x180] ss:$16 sps:$4 sm:$0xff]   ;;  %v3668_v53 = vld [vmem:[#allocation2 + $0x188] ss:$16 sps:$4 sm:$0xff]   ;;  %v3109_v4 = vcombine.low %v56_v46, %v56_v46 }
  0x38   :  { %1460 = vmatpush1.bf16.msra.mxu0 %v3619_v18  ;;  %1624 = vmatpush1.bf16.msra.mxu1 %v3620_v19  ;;  %v3669_v54 = vld [vmem:[#allocation2 + $0x1a4] ss:$16 sps:$4 sm:$0xff]   ;;  %v3671_v55 = vld [vmem:[#allocation2 + $0x1ac] ss:$16 sps:$4 sm:$0xff]   ;;  %v3673_v56 = vld [vmem:[#allocation2 + $0x1a0] ss:$16 sps:$4 sm:$0xff]  }
  0x39   :  { %1461 = vmatprep.subr.bf16.mxu0 %v3621_v20  ;;  %1625 = vmatprep.subr.bf16.mxu1 %v3623_v21  ;;  %v3674_v57 = vld [vmem:[#allocation2 + $0x1a8] ss:$16 sps:$4 sm:$0xff]   ;;  %v3675_v58 = vld [vmem:[#allocation2 + $0x1c4] ss:$16 sps:$4 sm:$0xff]   ;;  %v3677_v59 = vld [vmem:[#allocation2 + $0x1cc] ss:$16 sps:$4 sm:$0xff]  }
  0x3a   :  { %1483 = vmatprep.mubr.bf16.mxu0 %v3110_v48  ;;  %1647 = vmatprep.mubr.bf16.mxu1 %v3110_v48  ;;  %v3679_v60 = vld [vmem:[#allocation2 + $0x1c0] ss:$16 sps:$4 sm:$0xff]   ;;  %v3680_v61 = vld [vmem:[#allocation2 + $0x1c8] ss:$16 sps:$4 sm:$0xff]   ;;  %v3681_v62 = vld [vmem:[#allocation2 + $0x1e4] ss:$16 sps:$4 sm:$0xff]  }
  0x3b   :  { %v3683_v63 = vld [vmem:[#allocation2 + $0x1ec] ss:$16 sps:$4 sm:$0xff]   ;;  %v3685_v0 = vld [vmem:[#allocation2 + $0x1e0] ss:$16 sps:$4 sm:$0xff]   ;;  %v3686_v1 = vld [vmem:[#allocation2 + $0x1e8] ss:$16 sps:$4 sm:$0xff]  }
  0x3c   :  { %1462 = vmatpush1.bf16.msra.mxu0 %v3625_v22  ;;  %1626 = vmatpush1.bf16.msra.mxu1 %v3626_v23  ;;  %v3691_v2 = vld [vmem:[#allocation2 + $0x204] ss:$16 sps:$4 sm:$0xff]   ;;  %v3694_v3 = vld [vmem:[#allocation2 + $0x20c] ss:$16 sps:$4 sm:$0xff]   ;;  %v3689_v5 = vld [vmem:[#allocation2 + $0x200] ss:$16 sps:$4 sm:$0xff]  }
  0x3d   :  { %1463 = vmatprep.subr.bf16.mxu0 %v3627_v24  ;;  %1627 = vmatprep.subr.bf16.mxu1 %v3629_v25  ;;  %v3692_v6 = vld [vmem:[#allocation2 + $0x208] ss:$16 sps:$4 sm:$0xff]   ;;  %v3697_v7 = vld [vmem:[#allocation2 + $0x224] ss:$16 sps:$4 sm:$0xff]   ;;  %v3700_v8 = vld [vmem:[#allocation2 + $0x22c] ss:$16 sps:$4 sm:$0xff]  }
  0x3e   :  { %v3695_v9 = vld [vmem:[#allocation2 + $0x220] ss:$16 sps:$4 sm:$0xff]   ;;  %v3698_v10 = vld [vmem:[#allocation2 + $0x228] ss:$16 sps:$4 sm:$0xff]   ;;  %v3703_v11 = vld [vmem:[#allocation2 + $0x244] ss:$16 sps:$4 sm:$0xff]  }
  0x3f   :  { %v3706_v12 = vld [vmem:[#allocation2 + $0x24c] ss:$16 sps:$4 sm:$0xff]   ;;  %v3701_v13 = vld [vmem:[#allocation2 + $0x240] ss:$16 sps:$4 sm:$0xff]   ;;  %v3704_v14 = vld [vmem:[#allocation2 + $0x248] ss:$16 sps:$4 sm:$0xff]  }
  0x40   :  { %1464 = vmatpush1.bf16.msra.mxu0 %v3631_v26  ;;  %1628 = vmatpush1.bf16.msra.mxu1 %v3632_v27  ;;  %v3709_v15 = vld [vmem:[#allocation2 + $0x264] ss:$16 sps:$4 sm:$0xff]   ;;  %v3712_v16 = vld [vmem:[#allocation2 + $0x26c] ss:$16 sps:$4 sm:$0xff]   ;;  %v3707_v17 = vld [vmem:[#allocation2 + $0x260] ss:$16 sps:$4 sm:$0xff]  }
  0x41   :  { %1465 = vmatprep.subr.bf16.mxu0 %v3633_v28  ;;  %1629 = vmatprep.subr.bf16.mxu1 %v3635_v29  ;;  %v3710_v18 = vld [vmem:[#allocation2 + $0x268] ss:$16 sps:$4 sm:$0xff]   ;;  %v3715_v19 = vld [vmem:[#allocation2 + $0x284] ss:$16 sps:$4 sm:$0xff]   ;;  %v3718_v20 = vld [vmem:[#allocation2 + $0x28c] ss:$16 sps:$4 sm:$0xff]  }
  0x42   :  { %v3713_v21 = vld [vmem:[#allocation2 + $0x280] ss:$16 sps:$4 sm:$0xff]   ;;  %v3716_v22 = vld [vmem:[#allocation2 + $0x288] ss:$16 sps:$4 sm:$0xff]   ;;  %v3721_v23 = vld [vmem:[#allocation2 + $0x2a4] ss:$16 sps:$4 sm:$0xff]  }
  0x43   :  { %v3724_v24 = vld [vmem:[#allocation2 + $0x2ac] ss:$16 sps:$4 sm:$0xff]   ;;  %v3719_v25 = vld [vmem:[#allocation2 + $0x2a0] ss:$16 sps:$4 sm:$0xff]   ;;  %v3722_v26 = vld [vmem:[#allocation2 + $0x2a8] ss:$16 sps:$4 sm:$0xff]  }
  0x44   :  { %1466 = vmatpush1.bf16.msra.mxu0 %v3637_v30  ;;  %1630 = vmatpush1.bf16.msra.mxu1 %v3638_v31  ;;  %v3727_v27 = vld [vmem:[#allocation2 + $0x2c4] ss:$16 sps:$4 sm:$0xff]   ;;  %v3730_v28 = vld [vmem:[#allocation2 + $0x2cc] ss:$16 sps:$4 sm:$0xff]   ;;  %v3725_v31 = vld [vmem:[#allocation2 + $0x2c0] ss:$16 sps:$4 sm:$0xff]  }
  0x45   :  { %1467 = vmatprep.subr.bf16.mxu0 %v3639_v32  ;;  %1631 = vmatprep.subr.bf16.mxu1 %v3641_v33  ;;  %v4306_v29 = vld [vmem:[%s4472_s0 + $0x8] sm:$0xff]  ;;  %v3733_v33 = vld [vmem:[#allocation2 + $0x2e4] ss:$16 sps:$4 sm:$0xff]   ;;  %s3099_s23 = sshll.u32 %s4235_s22, 4  ;;  %s3100_s23 = int_to_ptr.vmem [resolvable:$true] %s3099_s23 }
  0x46   :  { %v3112_v30 = vcombine.high %v4306_v29, %v4306_v29  ;;  %v3728_v32 = vld [vmem:[#allocation2 + $0x2c8] ss:$16 sps:$4 sm:$0xff]   ;;  %v3754_v46 = vld [vmem:[#allocation2 + $0x34c] ss:$16 sps:$4 sm:$0xff]   ;;  %s4202_s24 = scalar_lea.vmem %s3100_s23, 128  ;;  %p4207_p3 = scmp.lt.s32.totalorder %s3100_s23, %s3100_s23 }
  0x47   :  { %v3752_v48 = vld [vmem:[#allocation2 + $0x348] ss:$16 sps:$4 sm:$0xff]   ;;  %p4203_p2 = scmp.ne.s32.totalorder %s3100_s23, %s4202_s24  ;;  %p4208_p4 = scmp.lt.s32.totalorder %s4202_s24, %s4202_s24 }
  0x48   :  { %1468 = vmatpush1.bf16.msra.mxu0 %v3643_v34  ;;  %1632 = vmatpush1.bf16.msra.mxu1 %v3644_v35  ;;  %v3736_v34 = vld [vmem:[#allocation2 + $0x2ec] ss:$16 sps:$4 sm:$0xff]   ;;  %v3731_v35 = vld [vmem:[#allocation2 + $0x2e0] ss:$16 sps:$4 sm:$0xff]  }
  0x49   :  { %1469 = vmatprep.subr.bf16.mxu0 %v3645_v36  ;;  %1633 = vmatprep.subr.bf16.mxu1 %v3647_v37  ;;  %v3734_v36 = vld [vmem:[#allocation2 + $0x2e8] ss:$16 sps:$4 sm:$0xff]   ;;  %v3739_v37 = vld [vmem:[#allocation2 + $0x304] ss:$16 sps:$4 sm:$0xff]   ;;  %p4209_p5 = por %p4208_p4, %p4207_p3 }
  0x4b   :  { %p4210_p6 = pnand %p4209_p5, %p4203_p2 }
  0x4c   :  { %1470 = vmatpush1.bf16.msra.mxu0 %v3649_v38  ;;  %1634 = vmatpush1.bf16.msra.mxu1 %v3650_v39  ;;  %v3742_v38 = vld [vmem:[#allocation2 + $0x30c] ss:$16 sps:$4 sm:$0xff]   ;;  %v3737_v39 = vld [vmem:[#allocation2 + $0x300] ss:$16 sps:$4 sm:$0xff]  }
  0x4d   :  { %1471 = vmatprep.subr.bf16.mxu0 %v3651_v40  ;;  %1635 = vmatprep.subr.bf16.mxu1 %v3653_v41  ;;  %v3740_v40 = vld [vmem:[#allocation2 + $0x308] ss:$16 sps:$4 sm:$0xff]   ;;  %v3745_v41 = vld [vmem:[#allocation2 + $0x324] ss:$16 sps:$4 sm:$0xff]  }
  0x50   :  { %1472 = vmatpush1.bf16.msra.mxu0 %v3655_v42  ;;  %1636 = vmatpush1.bf16.msra.mxu1 %v3656_v43  ;;  %v3748_v42 = vld [vmem:[#allocation2 + $0x32c] ss:$16 sps:$4 sm:$0xff]   ;;  %v3743_v43 = vld [vmem:[#allocation2 + $0x320] ss:$16 sps:$4 sm:$0xff]  }
  0x51   :  { %1473 = vmatprep.subr.bf16.mxu0 %v3657_v44  ;;  %1637 = vmatprep.subr.bf16.mxu1 %v3659_v45  ;;  %v3746_v44 = vld [vmem:[#allocation2 + $0x328] ss:$16 sps:$4 sm:$0xff]   ;;  %v3751_v45 = vld [vmem:[#allocation2 + $0x344] ss:$16 sps:$4 sm:$0xff]  }
  0x54   :  { %1474 = vmatpush1.bf16.msra.mxu0 %v3661_v47  ;;  %1638 = vmatpush1.bf16.msra.mxu1 %v3662_v49  ;;  %v3749_v47 = vld [vmem:[#allocation2 + $0x340] ss:$16 sps:$4 sm:$0xff]   ;;  %v3757_v49 = vld [vmem:[#allocation2 + $0x364] ss:$16 sps:$4 sm:$0xff]  }
  0x55   :  { %1475 = vmatprep.subr.bf16.mxu0 %v3663_v50  ;;  %1639 = vmatprep.subr.bf16.mxu1 %v3665_v51  ;;  %v3760_v50 = vld [vmem:[#allocation2 + $0x36c] ss:$16 sps:$4 sm:$0xff]   ;;  %v3755_v51 = vld [vmem:[#allocation2 + $0x360] ss:$16 sps:$4 sm:$0xff]  }
  0x58   :  { %1476 = vmatpush1.bf16.msra.mxu0 %v3667_v52  ;;  %1640 = vmatpush1.bf16.msra.mxu1 %v3668_v53  ;;  %v3758_v52 = vld [vmem:[#allocation2 + $0x368] ss:$16 sps:$4 sm:$0xff]   ;;  %v3763_v53 = vld [vmem:[#allocation2 + $0x384] ss:$16 sps:$4 sm:$0xff]  }
  0x59   :  { %1477 = vmatprep.subr.bf16.mxu0 %v3669_v54  ;;  %1641 = vmatprep.subr.bf16.mxu1 %v3671_v55  ;;  %v3766_v54 = vld [vmem:[#allocation2 + $0x38c] ss:$16 sps:$4 sm:$0xff]   ;;  %v3761_v55 = vld [vmem:[#allocation2 + $0x380] ss:$16 sps:$4 sm:$0xff]  }
  0x5c   :  { %1478 = vmatpush1.bf16.msra.mxu0 %v3673_v56  ;;  %1642 = vmatpush1.bf16.msra.mxu1 %v3674_v57  ;;  %v3764_v56 = vld [vmem:[#allocation2 + $0x388] ss:$16 sps:$4 sm:$0xff]   ;;  %v3769_v57 = vld [vmem:[#allocation2 + $0x3a4] ss:$16 sps:$4 sm:$0xff]  }
  0x5d   :  { %1479 = vmatprep.subr.bf16.mxu0 %v3675_v58  ;;  %1643 = vmatprep.subr.bf16.mxu1 %v3677_v59  ;;  %v3772_v58 = vld [vmem:[#allocation2 + $0x3ac] ss:$16 sps:$4 sm:$0xff]   ;;  %v3767_v59 = vld [vmem:[#allocation2 + $0x3a0] ss:$16 sps:$4 sm:$0xff]  }
  0x60   :  { %1480 = vmatpush1.bf16.msra.mxu0 %v3679_v60  ;;  %1644 = vmatpush1.bf16.msra.mxu1 %v3680_v61  ;;  %v3770_v60 = vld [vmem:[#allocation2 + $0x3a8] ss:$16 sps:$4 sm:$0xff]   ;;  %v3775_v61 = vld [vmem:[#allocation2 + $0x3c4] ss:$16 sps:$4 sm:$0xff]  }
  0x61   :  { %1481 = vmatprep.subr.bf16.mxu0 %v3681_v62  ;;  %1645 = vmatprep.subr.bf16.mxu1 %v3683_v63  ;;  %v3778_v62 = vld [vmem:[#allocation2 + $0x3cc] ss:$16 sps:$4 sm:$0xff]   ;;  %v3773_v63 = vld [vmem:[#allocation2 + $0x3c0] ss:$16 sps:$4 sm:$0xff]  }
  0x64   :  { %1482 = vmatpush1.bf16.msra.mxu0 %v3685_v0  ;;  %1646 = vmatpush1.bf16.msra.mxu1 %v3686_v1  ;;  %v3776_v0 = vld [vmem:[#allocation2 + $0x3c8] ss:$16 sps:$4 sm:$0xff]   ;;  %v3781_v1 = vld [vmem:[#allocation2 + $0x3e4] ss:$16 sps:$4 sm:$0xff]  }
  0x65   :  { %1492 = vmatprep.subr.bf16.mxu0 %v3691_v2  ;;  %1656 = vmatprep.subr.bf16.mxu1 %v3694_v3  ;;  %v3784_v2 = vld [vmem:[#allocation2 + $0x3ec] ss:$16 sps:$4 sm:$0xff]   ;;  %v3779_v3 = vld [vmem:[#allocation2 + $0x3e0] ss:$16 sps:$4 sm:$0xff]  }
  0x67   :  { %1484 = vmatmul.mubr.bf16.vlgmr.msra.gmra.mrb[0].mxu0 %v3109_v4  ;;  %1648 = vmatmul.mubr.bf16.vlgmr.msra.gmra.mrb[0].mxu1 %v3109_v4  ;;  %v3782_v4 = vld [vmem:[#allocation2 + $0x3e8] ss:$16 sps:$4 sm:$0xff]  }
  0x68   :  { %1493 = vmatpush1.bf16.msra.mxu0 %v3689_v5  ;;  %1657 = vmatpush1.bf16.msra.mxu1 %v3692_v6  ;;  %v3789_v5 = vld [vmem:[#allocation2 + $0x404] ss:$16 sps:$4 sm:$0xff]   ;;  %v3792_v6 = vld [vmem:[#allocation2 + $0x40c] ss:$16 sps:$4 sm:$0xff]  }
  0x69   :  { %1494 = vmatprep.subr.bf16.mxu0 %v3697_v7  ;;  %1658 = vmatprep.subr.bf16.mxu1 %v3700_v8  ;;  %v3111_v7 = vcombine.low %v4306_v29, %v4306_v29  ;;  %v3787_v8 = vld [vmem:[#allocation2 + $0x400] ss:$16 sps:$4 sm:$0xff]   ;;  %v3822_v29 = vld [vmem:[#allocation2 + $0x4ac] ss:$16 sps:$4 sm:$0xff]  }
  0x6a   :  { %1524 = vmatprep.mubr.bf16.mxu0 %v3112_v30  ;;  %1688 = vmatprep.mubr.bf16.mxu1 %v3112_v30  ;;  %v3817_v30 = vld [vmem:[#allocation2 + $0x4a0] ss:$16 sps:$4 sm:$0xff]  }
  0x6c   :  { %1495 = vmatpush1.bf16.msra.mxu0 %v3695_v9  ;;  %1659 = vmatpush1.bf16.msra.mxu1 %v3698_v10  ;;  %v3790_v9 = vld [vmem:[#allocation2 + $0x408] ss:$16 sps:$4 sm:$0xff]   ;;  %v3795_v10 = vld [vmem:[#allocation2 + $0x424] ss:$16 sps:$4 sm:$0xff]  }
  0x6d   :  { %1496 = vmatprep.subr.bf16.mxu0 %v3703_v11  ;;  %1660 = vmatprep.subr.bf16.mxu1 %v3706_v12  ;;  %v4315_v11 = vld [vmem:[%s4472_s0 + $0x10] sm:$0xff]  ;;  %v3798_v12 = vld [vmem:[#allocation2 + $0x42c] ss:$16 sps:$4 sm:$0xff]  }
  0x70   :  { %1497 = vmatpush1.bf16.msra.mxu0 %v3701_v13  ;;  %1661 = vmatpush1.bf16.msra.mxu1 %v3704_v14  ;;  %v3114_v13 = vcombine.high %v4315_v11, %v4315_v11  ;;  %v3793_v14 = vld [vmem:[#allocation2 + $0x420] ss:$16 sps:$4 sm:$0xff]  }
  0x71   :  { %1498 = vmatprep.subr.bf16.mxu0 %v3709_v15  ;;  %1662 = vmatprep.subr.bf16.mxu1 %v3712_v16  ;;  %v3796_v15 = vld [vmem:[#allocation2 + $0x428] ss:$16 sps:$4 sm:$0xff]   ;;  %v3801_v16 = vld [vmem:[#allocation2 + $0x444] ss:$16 sps:$4 sm:$0xff]  }
  0x74   :  { %1499 = vmatpush1.bf16.msra.mxu0 %v3707_v17  ;;  %1663 = vmatpush1.bf16.msra.mxu1 %v3710_v18  ;;  %v3804_v17 = vld [vmem:[#allocation2 + $0x44c] ss:$16 sps:$4 sm:$0xff]   ;;  %v3799_v18 = vld [vmem:[#allocation2 + $0x440] ss:$16 sps:$4 sm:$0xff]  }
  0x75   :  { %1500 = vmatprep.subr.bf16.mxu0 %v3715_v19  ;;  %1664 = vmatprep.subr.bf16.mxu1 %v3718_v20  ;;  %v3802_v19 = vld [vmem:[#allocation2 + $0x448] ss:$16 sps:$4 sm:$0xff]   ;;  %v3807_v20 = vld [vmem:[#allocation2 + $0x464] ss:$16 sps:$4 sm:$0xff]  }
  0x78   :  { %1501 = vmatpush1.bf16.msra.mxu0 %v3713_v21  ;;  %1665 = vmatpush1.bf16.msra.mxu1 %v3716_v22  ;;  %v3810_v21 = vld [vmem:[#allocation2 + $0x46c] ss:$16 sps:$4 sm:$0xff]   ;;  %v3805_v22 = vld [vmem:[#allocation2 + $0x460] ss:$16 sps:$4 sm:$0xff]  }
  0x79   :  { %1502 = vmatprep.subr.bf16.mxu0 %v3721_v23  ;;  %1666 = vmatprep.subr.bf16.mxu1 %v3724_v24  ;;  %v3808_v23 = vld [vmem:[#allocation2 + $0x468] ss:$16 sps:$4 sm:$0xff]   ;;  %v3813_v24 = vld [vmem:[#allocation2 + $0x484] ss:$16 sps:$4 sm:$0xff]  }
  0x7c   :  { %1503 = vmatpush1.bf16.msra.mxu0 %v3719_v25  ;;  %1667 = vmatpush1.bf16.msra.mxu1 %v3722_v26  ;;  %v3816_v25 = vld [vmem:[#allocation2 + $0x48c] ss:$16 sps:$4 sm:$0xff]   ;;  %v3811_v26 = vld [vmem:[#allocation2 + $0x480] ss:$16 sps:$4 sm:$0xff]  }
  0x7d   :  { %1504 = vmatprep.subr.bf16.mxu0 %v3727_v27  ;;  %1668 = vmatprep.subr.bf16.mxu1 %v3730_v28  ;;  %v3814_v27 = vld [vmem:[#allocation2 + $0x488] ss:$16 sps:$4 sm:$0xff]   ;;  %v3819_v28 = vld [vmem:[#allocation2 + $0x4a4] ss:$16 sps:$4 sm:$0xff]  }
  0x80   :  { %1505 = vmatpush1.bf16.msra.mxu0 %v3725_v31  ;;  %1669 = vmatpush1.bf16.msra.mxu1 %v3728_v32  ;;  %v3820_v31 = vld [vmem:[#allocation2 + $0x4a8] ss:$16 sps:$4 sm:$0xff]   ;;  %v3825_v32 = vld [vmem:[#allocation2 + $0x4c4] ss:$16 sps:$4 sm:$0xff]  }
  0x81   :  { %1506 = vmatprep.subr.bf16.mxu0 %v3733_v33  ;;  %1670 = vmatprep.subr.bf16.mxu1 %v3736_v34  ;;  %v3828_v33 = vld [vmem:[#allocation2 + $0x4cc] ss:$16 sps:$4 sm:$0xff]   ;;  %v3823_v34 = vld [vmem:[#allocation2 + $0x4c0] ss:$16 sps:$4 sm:$0xff]  }
  0x84   :  { %1507 = vmatpush1.bf16.msra.mxu0 %v3731_v35  ;;  %1671 = vmatpush1.bf16.msra.mxu1 %v3734_v36  ;;  %v3826_v35 = vld [vmem:[#allocation2 + $0x4c8] ss:$16 sps:$4 sm:$0xff]   ;;  %v3831_v36 = vld [vmem:[#allocation2 + $0x4e4] ss:$16 sps:$4 sm:$0xff]  }
  0x85   :  { %1508 = vmatprep.subr.bf16.mxu0 %v3739_v37  ;;  %1672 = vmatprep.subr.bf16.mxu1 %v3742_v38  ;;  %v3834_v37 = vld [vmem:[#allocation2 + $0x4ec] ss:$16 sps:$4 sm:$0xff]   ;;  %v3829_v38 = vld [vmem:[#allocation2 + $0x4e0] ss:$16 sps:$4 sm:$0xff]  }
  0x88   :  { %1509 = vmatpush1.bf16.msra.mxu0 %v3737_v39  ;;  %1673 = vmatpush1.bf16.msra.mxu1 %v3740_v40  ;;  %v3832_v39 = vld [vmem:[#allocation2 + $0x4e8] ss:$16 sps:$4 sm:$0xff]   ;;  %v3837_v40 = vld [vmem:[#allocation2 + $0x504] ss:$16 sps:$4 sm:$0xff]  }
  0x89   :  { %1510 = vmatprep.subr.bf16.mxu0 %v3745_v41  ;;  %1674 = vmatprep.subr.bf16.mxu1 %v3748_v42  ;;  %v3840_v41 = vld [vmem:[#allocation2 + $0x50c] ss:$16 sps:$4 sm:$0xff]   ;;  %v3835_v42 = vld [vmem:[#allocation2 + $0x500] ss:$16 sps:$4 sm:$0xff]  }
  0x8c   :  { %1511 = vmatpush1.bf16.msra.mxu0 %v3743_v43  ;;  %1675 = vmatpush1.bf16.msra.mxu1 %v3746_v44  ;;  %v3838_v43 = vld [vmem:[#allocation2 + $0x508] ss:$16 sps:$4 sm:$0xff]   ;;  %v3843_v44 = vld [vmem:[#allocation2 + $0x524] ss:$16 sps:$4 sm:$0xff]  }
  0x8d   :  { %1512 = vmatprep.subr.bf16.mxu0 %v3751_v45  ;;  %1676 = vmatprep.subr.bf16.mxu1 %v3754_v46  ;;  %v3846_v45 = vld [vmem:[#allocation2 + $0x52c] ss:$16 sps:$4 sm:$0xff]   ;;  %v3841_v46 = vld [vmem:[#allocation2 + $0x520] ss:$16 sps:$4 sm:$0xff]  }
  0x90   :  { %1513 = vmatpush1.bf16.msra.mxu0 %v3749_v47  ;;  %1677 = vmatpush1.bf16.msra.mxu1 %v3752_v48  ;;  %v3844_v47 = vld [vmem:[#allocation2 + $0x528] ss:$16 sps:$4 sm:$0xff]   ;;  %v3849_v48 = vld [vmem:[#allocation2 + $0x544] ss:$16 sps:$4 sm:$0xff]  }
  0x91   :  { %1514 = vmatprep.subr.bf16.mxu0 %v3757_v49  ;;  %1678 = vmatprep.subr.bf16.mxu1 %v3760_v50  ;;  %v3852_v49 = vld [vmem:[#allocation2 + $0x54c] ss:$16 sps:$4 sm:$0xff]   ;;  %v3847_v50 = vld [vmem:[#allocation2 + $0x540] ss:$16 sps:$4 sm:$0xff]  }
  0x94   :  { %1515 = vmatpush1.bf16.msra.mxu0 %v3755_v51  ;;  %1679 = vmatpush1.bf16.msra.mxu1 %v3758_v52  ;;  %v3850_v51 = vld [vmem:[#allocation2 + $0x548] ss:$16 sps:$4 sm:$0xff]   ;;  %v3855_v52 = vld [vmem:[#allocation2 + $0x564] ss:$16 sps:$4 sm:$0xff]  }
  0x95   :  { %1516 = vmatprep.subr.bf16.mxu0 %v3763_v53  ;;  %1680 = vmatprep.subr.bf16.mxu1 %v3766_v54  ;;  %v3858_v53 = vld [vmem:[#allocation2 + $0x56c] ss:$16 sps:$4 sm:$0xff]   ;;  %v3853_v54 = vld [vmem:[#allocation2 + $0x560] ss:$16 sps:$4 sm:$0xff]  }
  0x98   :  { %1517 = vmatpush1.bf16.msra.mxu0 %v3761_v55  ;;  %1681 = vmatpush1.bf16.msra.mxu1 %v3764_v56  ;;  %v3856_v55 = vld [vmem:[#allocation2 + $0x568] ss:$16 sps:$4 sm:$0xff]   ;;  %v3861_v56 = vld [vmem:[#allocation2 + $0x584] ss:$16 sps:$4 sm:$0xff]  }
  0x99   :  { %1518 = vmatprep.subr.bf16.mxu0 %v3769_v57  ;;  %1682 = vmatprep.subr.bf16.mxu1 %v3772_v58  ;;  %v3864_v57 = vld [vmem:[#allocation2 + $0x58c] ss:$16 sps:$4 sm:$0xff]   ;;  %v3859_v58 = vld [vmem:[#allocation2 + $0x580] ss:$16 sps:$4 sm:$0xff]  }
  0x9c   :  { %1519 = vmatpush1.bf16.msra.mxu0 %v3767_v59  ;;  %1683 = vmatpush1.bf16.msra.mxu1 %v3770_v60  ;;  %v3862_v59 = vld [vmem:[#allocation2 + $0x588] ss:$16 sps:$4 sm:$0xff]   ;;  %v3867_v60 = vld [vmem:[#allocation2 + $0x5a4] ss:$16 sps:$4 sm:$0xff]  }
  0x9d   :  { %1520 = vmatprep.subr.bf16.mxu0 %v3775_v61  ;;  %1684 = vmatprep.subr.bf16.mxu1 %v3778_v62  ;;  %v3870_v61 = vld [vmem:[#allocation2 + $0x5ac] ss:$16 sps:$4 sm:$0xff]   ;;  %v3865_v62 = vld [vmem:[#allocation2 + $0x5a0] ss:$16 sps:$4 sm:$0xff]  }
  0xa0   :  { %1521 = vmatpush1.bf16.msra.mxu0 %v3773_v63  ;;  %1685 = vmatpush1.bf16.msra.mxu1 %v3776_v0  ;;  %v3868_v63 = vld [vmem:[#allocation2 + $0x5a8] ss:$16 sps:$4 sm:$0xff]   ;;  %v3873_v0 = vld [vmem:[#allocation2 + $0x5c4] ss:$16 sps:$4 sm:$0xff]  }
  0xa1   :  { %1522 = vmatprep.subr.bf16.mxu0 %v3781_v1  ;;  %1686 = vmatprep.subr.bf16.mxu1 %v3784_v2  ;;  %v3876_v1 = vld [vmem:[#allocation2 + $0x5cc] ss:$16 sps:$4 sm:$0xff]   ;;  %v3871_v2 = vld [vmem:[#allocation2 + $0x5c0] ss:$16 sps:$4 sm:$0xff]  }
  0xa4   :  { %1523 = vmatpush1.bf16.msra.mxu0 %v3779_v3  ;;  %1687 = vmatpush1.bf16.msra.mxu1 %v3782_v4  ;;  %v3874_v3 = vld [vmem:[#allocation2 + $0x5c8] ss:$16 sps:$4 sm:$0xff]   ;;  %v3879_v4 = vld [vmem:[#allocation2 + $0x5e4] ss:$16 sps:$4 sm:$0xff]  }
  0xa5   :  { %1533 = vmatprep.subr.bf16.mxu0 %v3789_v5  ;;  %1697 = vmatprep.subr.bf16.mxu1 %v3792_v6  ;;  %v3882_v5 = vld [vmem:[#allocation2 + $0x5ec] ss:$16 sps:$4 sm:$0xff]   ;;  %v3877_v6 = vld [vmem:[#allocation2 + $0x5e0] ss:$16 sps:$4 sm:$0xff]  }
  0xa7   :  { %1525 = vmatmul.mubr.bf16.vlgmr.msra.gmra.mrb[0].mxu0 %v3111_v7  ;;  %1689 = vmatmul.mubr.bf16.vlgmr.msra.gmra.mrb[0].mxu1 %v3111_v7  ;;  %v3880_v7 = vld [vmem:[#allocation2 + $0x5e8] ss:$16 sps:$4 sm:$0xff]  }
  0xa8   :  { %1534 = vmatpush1.bf16.msra.mxu0 %v3787_v8  ;;  %1698 = vmatpush1.bf16.msra.mxu1 %v3790_v9  ;;  %v3887_v8 = vld [vmem:[#allocation2 + $0x604] ss:$16 sps:$4 sm:$0xff]   ;;  %v3890_v9 = vld [vmem:[#allocation2 + $0x60c] ss:$16 sps:$4 sm:$0xff]  }
  0xa9   :  { %1535 = vmatprep.subr.bf16.mxu0 %v3795_v10  ;;  %1699 = vmatprep.subr.bf16.mxu1 %v3798_v12  ;;  %v3885_v10 = vld [vmem:[#allocation2 + $0x600] ss:$16 sps:$4 sm:$0xff]   ;;  %v3888_v12 = vld [vmem:[#allocation2 + $0x608] ss:$16 sps:$4 sm:$0xff]  }
  0xaa   :  { %1565 = vmatprep.mubr.bf16.mxu0 %v3114_v13  ;;  %1729 = vmatprep.mubr.bf16.mxu1 %v3114_v13  ;;  %v3113_v13 = vcombine.low %v4315_v11, %v4315_v11  ;;  %v3905_v11 = vld [vmem:[#allocation2 + $0x664] ss:$16 sps:$4 sm:$0xff]  }
  0xac   :  { %1536 = vmatpush1.bf16.msra.mxu0 %v3793_v14  ;;  %1700 = vmatpush1.bf16.msra.mxu1 %v3796_v15  ;;  %v3893_v14 = vld [vmem:[#allocation2 + $0x624] ss:$16 sps:$4 sm:$0xff]   ;;  %v3896_v15 = vld [vmem:[#allocation2 + $0x62c] ss:$16 sps:$4 sm:$0xff]  }
  0xad   :  { %1537 = vmatprep.subr.bf16.mxu0 %v3801_v16  ;;  %1701 = vmatprep.subr.bf16.mxu1 %v3804_v17  ;;  %v3891_v16 = vld [vmem:[#allocation2 + $0x620] ss:$16 sps:$4 sm:$0xff]   ;;  %v3894_v17 = vld [vmem:[#allocation2 + $0x628] ss:$16 sps:$4 sm:$0xff]  }
  0xb0   :  { %1538 = vmatpush1.bf16.msra.mxu0 %v3799_v18  ;;  %1702 = vmatpush1.bf16.msra.mxu1 %v3802_v19  ;;  %v3899_v18 = vld [vmem:[#allocation2 + $0x644] ss:$16 sps:$4 sm:$0xff]   ;;  %v3902_v19 = vld [vmem:[#allocation2 + $0x64c] ss:$16 sps:$4 sm:$0xff]  }
  0xb1   :  { %1539 = vmatprep.subr.bf16.mxu0 %v3807_v20  ;;  %1703 = vmatprep.subr.bf16.mxu1 %v3810_v21  ;;  %v3897_v20 = vld [vmem:[#allocation2 + $0x640] ss:$16 sps:$4 sm:$0xff]   ;;  %v3900_v21 = vld [vmem:[#allocation2 + $0x648] ss:$16 sps:$4 sm:$0xff]  }
  0xb4   :  { %1540 = vmatpush1.bf16.msra.mxu0 %v3805_v22  ;;  %1704 = vmatpush1.bf16.msra.mxu1 %v3808_v23  ;;  %v4234_v22 = vmov 0   ;;  %v3908_v23 = vld [vmem:[#allocation2 + $0x66c] ss:$16 sps:$4 sm:$0xff]  }
  0xb5   :  { %1541 = vmatprep.subr.bf16.mxu0 %v3813_v24  ;;  %1705 = vmatprep.subr.bf16.mxu1 %v3816_v25  ;;  %v3903_v24 = vld [vmem:[#allocation2 + $0x660] ss:$16 sps:$4 sm:$0xff]   ;;  %v3906_v25 = vld [vmem:[#allocation2 + $0x668] ss:$16 sps:$4 sm:$0xff]  }
  0xb8   :  { %1542 = vmatpush1.bf16.msra.mxu0 %v3811_v26  ;;  %1706 = vmatpush1.bf16.msra.mxu1 %v3814_v27  ;;  %v3911_v26 = vld [vmem:[#allocation2 + $0x684] ss:$16 sps:$4 sm:$0xff]   ;;  %v3914_v27 = vld [vmem:[#allocation2 + $0x68c] ss:$16 sps:$4 sm:$0xff]  }
  0xb9   :  { %1543 = vmatprep.subr.bf16.mxu0 %v3819_v28  ;;  %1707 = vmatprep.subr.bf16.mxu1 %v3822_v29  ;;  %v3909_v28 = vld [vmem:[#allocation2 + $0x680] ss:$16 sps:$4 sm:$0xff]   ;;  %v3912_v29 = vld [vmem:[#allocation2 + $0x688] ss:$16 sps:$4 sm:$0xff]  }
  0xbc   :  { %1544 = vmatpush1.bf16.msra.mxu0 %v3817_v30  ;;  %1708 = vmatpush1.bf16.msra.mxu1 %v3820_v31  ;;  %v3917_v30 = vld [vmem:[#allocation2 + $0x6a4] ss:$16 sps:$4 sm:$0xff]   ;;  %v3920_v31 = vld [vmem:[#allocation2 + $0x6ac] ss:$16 sps:$4 sm:$0xff]  }
  0xbd   :  { %1545 = vmatprep.subr.bf16.mxu0 %v3825_v32  ;;  %1709 = vmatprep.subr.bf16.mxu1 %v3828_v33  ;;  %v3915_v32 = vld [vmem:[#allocation2 + $0x6a0] ss:$16 sps:$4 sm:$0xff]   ;;  %v3918_v33 = vld [vmem:[#allocation2 + $0x6a8] ss:$16 sps:$4 sm:$0xff]  }
  0xc0   :  { %1546 = vmatpush1.bf16.msra.mxu0 %v3823_v34  ;;  %1710 = vmatpush1.bf16.msra.mxu1 %v3826_v35  ;;  %v3923_v34 = vld [vmem:[#allocation2 + $0x6c4] ss:$16 sps:$4 sm:$0xff]   ;;  %v3926_v35 = vld [vmem:[#allocation2 + $0x6cc] ss:$16 sps:$4 sm:$0xff]  }
  0xc1   :  { %1547 = vmatprep.subr.bf16.mxu0 %v3831_v36  ;;  %1711 = vmatprep.subr.bf16.mxu1 %v3834_v37  ;;  %v3921_v36 = vld [vmem:[#allocation2 + $0x6c0] ss:$16 sps:$4 sm:$0xff]   ;;  %v3924_v37 = vld [vmem:[#allocation2 + $0x6c8] ss:$16 sps:$4 sm:$0xff]  }
  0xc4   :  { %1548 = vmatpush1.bf16.msra.mxu0 %v3829_v38  ;;  %1712 = vmatpush1.bf16.msra.mxu1 %v3832_v39  ;;  %v3929_v38 = vld [vmem:[#allocation2 + $0x6e4] ss:$16 sps:$4 sm:$0xff]   ;;  %v3932_v39 = vld [vmem:[#allocation2 + $0x6ec] ss:$16 sps:$4 sm:$0xff]  }
  0xc5   :  { %1549 = vmatprep.subr.bf16.mxu0 %v3837_v40  ;;  %1713 = vmatprep.subr.bf16.mxu1 %v3840_v41  ;;  %v3927_v40 = vld [vmem:[#allocation2 + $0x6e0] ss:$16 sps:$4 sm:$0xff]   ;;  %v3930_v41 = vld [vmem:[#allocation2 + $0x6e8] ss:$16 sps:$4 sm:$0xff]  }
  0xc8   :  { %1550 = vmatpush1.bf16.msra.mxu0 %v3835_v42  ;;  %1714 = vmatpush1.bf16.msra.mxu1 %v3838_v43  ;;  %v3936_v42 = vld [vmem:[#allocation5 + $0x4] ss:$16 sps:$4 sm:$0xff]   ;;  %v3939_v43 = vld [vmem:[#allocation5 + $0xc] ss:$16 sps:$4 sm:$0xff]  }
  0xc9   :  { %1551 = vmatprep.subr.bf16.mxu0 %v3843_v44  ;;  %1715 = vmatprep.subr.bf16.mxu1 %v3846_v45  ;;  %v3933_v44 = vld [vmem:[%s4472_s0 + $0x18] ss:$0 sps:$4 sm:$0xff]   ;;  %v3934_v45 = vld [vmem:[#allocation5] ss:$16 sps:$4 sm:$0xff]  }
  0xcc   :  { %1552 = vmatpush1.bf16.msra.mxu0 %v3841_v46  ;;  %1716 = vmatpush1.bf16.msra.mxu1 %v3844_v47  ;;  %v3937_v46 = vld [vmem:[#allocation5 + $0x8] ss:$16 sps:$4 sm:$0xff]   ;;  %v3942_v47 = vld [vmem:[#allocation5 + $0x24] ss:$16 sps:$4 sm:$0xff]  }
  0xcd   :  { %1553 = vmatprep.subr.bf16.mxu0 %v3849_v48  ;;  %1717 = vmatprep.subr.bf16.mxu1 %v3852_v49  ;;  %v3945_v48 = vld [vmem:[#allocation5 + $0x2c] ss:$16 sps:$4 sm:$0xff]   ;;  %v3940_v49 = vld [vmem:[#allocation5 + $0x20] ss:$16 sps:$4 sm:$0xff]  }
  0xd0   :  { %1554 = vmatpush1.bf16.msra.mxu0 %v3847_v50  ;;  %1718 = vmatpush1.bf16.msra.mxu1 %v3850_v51  ;;  %v3943_v50 = vld [vmem:[#allocation5 + $0x28] ss:$16 sps:$4 sm:$0xff]   ;;  %v3948_v51 = vld [vmem:[#allocation5 + $0x44] ss:$16 sps:$4 sm:$0xff]  }
  0xd1   :  { %1555 = vmatprep.subr.bf16.mxu0 %v3855_v52  ;;  %1719 = vmatprep.subr.bf16.mxu1 %v3858_v53  ;;  %v3951_v52 = vld [vmem:[#allocation5 + $0x4c] ss:$16 sps:$4 sm:$0xff]   ;;  %v3946_v53 = vld [vmem:[#allocation5 + $0x40] ss:$16 sps:$4 sm:$0xff]  }
  0xd4   :  { %1556 = vmatpush1.bf16.msra.mxu0 %v3853_v54  ;;  %1720 = vmatpush1.bf16.msra.mxu1 %v3856_v55  ;;  %v3949_v54 = vld [vmem:[#allocation5 + $0x48] ss:$16 sps:$4 sm:$0xff]   ;;  %v3954_v55 = vld [vmem:[#allocation5 + $0x64] ss:$16 sps:$4 sm:$0xff]  }
  0xd5   :  { %1557 = vmatprep.subr.bf16.mxu0 %v3861_v56  ;;  %1721 = vmatprep.subr.bf16.mxu1 %v3864_v57  ;;  %v3957_v56 = vld [vmem:[#allocation5 + $0x6c] ss:$16 sps:$4 sm:$0xff]   ;;  %v3952_v57 = vld [vmem:[#allocation5 + $0x60] ss:$16 sps:$4 sm:$0xff]  }
  0xd8   :  { %1558 = vmatpush1.bf16.msra.mxu0 %v3859_v58  ;;  %1722 = vmatpush1.bf16.msra.mxu1 %v3862_v59  ;;  %v3955_v58 = vld [vmem:[#allocation5 + $0x68] ss:$16 sps:$4 sm:$0xff]   ;;  %v3960_v59 = vld [vmem:[#allocation5 + $0x84] ss:$16 sps:$4 sm:$0xff]  }
  0xd9   :  { %1559 = vmatprep.subr.bf16.mxu0 %v3867_v60  ;;  %1723 = vmatprep.subr.bf16.mxu1 %v3870_v61  ;;  %v3963_v60 = vld [vmem:[#allocation5 + $0x8c] ss:$16 sps:$4 sm:$0xff]   ;;  %v3958_v61 = vld [vmem:[#allocation5 + $0x80] ss:$16 sps:$4 sm:$0xff]  }
  0xdc   :  { %1560 = vmatpush1.bf16.msra.mxu0 %v3865_v62  ;;  %1724 = vmatpush1.bf16.msra.mxu1 %v3868_v63  ;;  %v3961_v62 = vld [vmem:[#allocation5 + $0x88] ss:$16 sps:$4 sm:$0xff]   ;;  %v3966_v63 = vld [vmem:[#allocation5 + $0xa4] ss:$16 sps:$4 sm:$0xff]  }
  0xdd   :  { %1561 = vmatprep.subr.bf16.mxu0 %v3873_v0  ;;  %1725 = vmatprep.subr.bf16.mxu1 %v3876_v1  ;;  %v3969_v0 = vld [vmem:[#allocation5 + $0xac] ss:$16 sps:$4 sm:$0xff]   ;;  %v3964_v1 = vld [vmem:[#allocation5 + $0xa0] ss:$16 sps:$4 sm:$0xff]  }
  0xe0   :  { %1562 = vmatpush1.bf16.msra.mxu0 %v3871_v2  ;;  %1726 = vmatpush1.bf16.msra.mxu1 %v3874_v3  ;;  %v3967_v2 = vld [vmem:[#allocation5 + $0xa8] ss:$16 sps:$4 sm:$0xff]   ;;  %v3972_v3 = vld [vmem:[#allocation5 + $0xc4] ss:$16 sps:$4 sm:$0xff]  }
  0xe1   :  { %1563 = vmatprep.subr.bf16.mxu0 %v3879_v4  ;;  %1727 = vmatprep.subr.bf16.mxu1 %v3882_v5  ;;  %v3975_v4 = vld [vmem:[#allocation5 + $0xcc] ss:$16 sps:$4 sm:$0xff]   ;;  %v3970_v5 = vld [vmem:[#allocation5 + $0xc0] ss:$16 sps:$4 sm:$0xff]  }
  0xe4   :  { %1564 = vmatpush1.bf16.msra.mxu0 %v3877_v6  ;;  %1728 = vmatpush1.bf16.msra.mxu1 %v3880_v7  ;;  %v3973_v6 = vld [vmem:[#allocation5 + $0xc8] ss:$16 sps:$4 sm:$0xff]   ;;  %v3978_v7 = vld [vmem:[#allocation5 + $0xe4] ss:$16 sps:$4 sm:$0xff]  }
  0xe5   :  { %1574 = vmatprep.subr.bf16.mxu0 %v3887_v8  ;;  %1738 = vmatprep.subr.bf16.mxu1 %v3890_v9  ;;  %v3981_v8 = vld [vmem:[#allocation5 + $0xec] ss:$16 sps:$4 sm:$0xff]   ;;  %v3976_v9 = vld [vmem:[#allocation5 + $0xe0] ss:$16 sps:$4 sm:$0xff]  }
  0xe7   :  { %1566 = vmatmul.mubr.bf16.vlgmr.msra.gmra.mrb[0].mxu0 %v3113_v13  ;;  %1730 = vmatmul.mubr.bf16.vlgmr.msra.gmra.mrb[0].mxu1 %v3113_v13  ;;  %v3987_v13 = vld [vmem:[#allocation5 + $0x10c] ss:$16 sps:$4 sm:$0xff]  }
  0xe8   :  { %1575 = vmatpush1.bf16.msra.mxu0 %v3885_v10  ;;  %1739 = vmatpush1.bf16.msra.mxu1 %v3888_v12  ;;  %v3979_v10 = vld [vmem:[#allocation5 + $0xe8] ss:$16 sps:$4 sm:$0xff]   ;;  %v3984_v12 = vld [vmem:[#allocation5 + $0x104] ss:$16 sps:$4 sm:$0xff]  }
  0xe9   :  { %1576 = vmatprep.subr.bf16.mxu0 %v3893_v14  ;;  %1740 = vmatprep.subr.bf16.mxu1 %v3896_v15  ;;  %v3982_v14 = vld [vmem:[#allocation5 + $0x100] ss:$16 sps:$4 sm:$0xff]   ;;  %v3985_v15 = vld [vmem:[#allocation5 + $0x108] ss:$16 sps:$4 sm:$0xff]  }
  0xea   :  { %1606 = vmatprep.mubr.bf16.mxu0 %v4234_v22  ;;  %1770 = vmatprep.mubr.bf16.mxu1 %v4234_v22  ;;  %v3994_v22 = vld [vmem:[#allocation5 + $0x140] ss:$16 sps:$4 sm:$0xff]  }
  0xec   :  { %1577 = vmatpush1.bf16.msra.mxu0 %v3891_v16  ;;  %1741 = vmatpush1.bf16.msra.mxu1 %v3894_v17  ;;  %v3990_v16 = vld [vmem:[#allocation5 + $0x124] ss:$16 sps:$4 sm:$0xff]   ;;  %v3993_v17 = vld [vmem:[#allocation5 + $0x12c] ss:$16 sps:$4 sm:$0xff]  }
  0xed   :  { %1578 = vmatprep.subr.bf16.mxu0 %v3899_v18  ;;  %1742 = vmatprep.subr.bf16.mxu1 %v3902_v19  ;;  %v3988_v18 = vld [vmem:[#allocation5 + $0x120] ss:$16 sps:$4 sm:$0xff]   ;;  %v3991_v19 = vld [vmem:[#allocation5 + $0x128] ss:$16 sps:$4 sm:$0xff]  }
  0xf0   :  { %1579 = vmatpush1.bf16.msra.mxu0 %v3897_v20  ;;  %1743 = vmatpush1.bf16.msra.mxu1 %v3900_v21  ;;  %v3996_v20 = vld [vmem:[#allocation5 + $0x144] ss:$16 sps:$4 sm:$0xff]   ;;  %v3999_v21 = vld [vmem:[#allocation5 + $0x14c] ss:$16 sps:$4 sm:$0xff]  }
  0xf1   :  { %1580 = vmatprep.subr.bf16.mxu0 %v3905_v11  ;;  %1744 = vmatprep.subr.bf16.mxu1 %v3908_v23  ;;  %v3997_v11 = vld [vmem:[#allocation5 + $0x148] ss:$16 sps:$4 sm:$0xff]   ;;  %v4002_v23 = vld [vmem:[#allocation5 + $0x164] ss:$16 sps:$4 sm:$0xff]  }
  0xf4   :  { %1581 = vmatpush1.bf16.msra.mxu0 %v3903_v24  ;;  %1745 = vmatpush1.bf16.msra.mxu1 %v3906_v25  ;;  %v4005_v24 = vld [vmem:[#allocation5 + $0x16c] ss:$16 sps:$4 sm:$0xff]   ;;  %v4000_v25 = vld [vmem:[#allocation5 + $0x160] ss:$16 sps:$4 sm:$0xff]  }
  0xf5   :  { %1582 = vmatprep.subr.bf16.mxu0 %v3911_v26  ;;  %1746 = vmatprep.subr.bf16.mxu1 %v3914_v27  ;;  %v4003_v26 = vld [vmem:[#allocation5 + $0x168] ss:$16 sps:$4 sm:$0xff]   ;;  %v4008_v27 = vld [vmem:[#allocation5 + $0x184] ss:$16 sps:$4 sm:$0xff]  }
  0xf8   :  { %1583 = vmatpush1.bf16.msra.mxu0 %v3909_v28  ;;  %1747 = vmatpush1.bf16.msra.mxu1 %v3912_v29  ;;  %v4011_v28 = vld [vmem:[#allocation5 + $0x18c] ss:$16 sps:$4 sm:$0xff]   ;;  %v4006_v29 = vld [vmem:[#allocation5 + $0x180] ss:$16 sps:$4 sm:$0xff]  }
  0xf9   :  { %1584 = vmatprep.subr.bf16.mxu0 %v3917_v30  ;;  %1748 = vmatprep.subr.bf16.mxu1 %v3920_v31  ;;  %v4009_v30 = vld [vmem:[#allocation5 + $0x188] ss:$16 sps:$4 sm:$0xff]   ;;  %v4014_v31 = vld [vmem:[#allocation5 + $0x1a4] ss:$16 sps:$4 sm:$0xff]  }
  0xfc   :  { %1585 = vmatpush1.bf16.msra.mxu0 %v3915_v32  ;;  %1749 = vmatpush1.bf16.msra.mxu1 %v3918_v33  ;;  %v4017_v32 = vld [vmem:[#allocation5 + $0x1ac] ss:$16 sps:$4 sm:$0xff]   ;;  %v4012_v33 = vld [vmem:[#allocation5 + $0x1a0] ss:$16 sps:$4 sm:$0xff]  }
  0xfd   :  { %1586 = vmatprep.subr.bf16.mxu0 %v3923_v34  ;;  %1750 = vmatprep.subr.bf16.mxu1 %v3926_v35  ;;  %v4015_v34 = vld [vmem:[#allocation5 + $0x1a8] ss:$16 sps:$4 sm:$0xff]   ;;  %v4020_v35 = vld [vmem:[#allocation5 + $0x1c4] ss:$16 sps:$4 sm:$0xff]  }
 0x100   :  { %1587 = vmatpush1.bf16.msra.mxu0 %v3921_v36  ;;  %1751 = vmatpush1.bf16.msra.mxu1 %v3924_v37  ;;  %v4023_v36 = vld [vmem:[#allocation5 + $0x1cc] ss:$16 sps:$4 sm:$0xff]   ;;  %v4018_v37 = vld [vmem:[#allocation5 + $0x1c0] ss:$16 sps:$4 sm:$0xff]  }
 0x101   :  { %1588 = vmatprep.subr.bf16.mxu0 %v3929_v38  ;;  %1752 = vmatprep.subr.bf16.mxu1 %v3932_v39  ;;  %v4021_v38 = vld [vmem:[#allocation5 + $0x1c8] ss:$16 sps:$4 sm:$0xff]   ;;  %v4026_v39 = vld [vmem:[#allocation5 + $0x1e4] ss:$16 sps:$4 sm:$0xff]  }
 0x104   :  { %1589 = vmatpush1.bf16.msra.mxu0 %v3927_v40  ;;  %1753 = vmatpush1.bf16.msra.mxu1 %v3930_v41  ;;  %v4029_v40 = vld [vmem:[#allocation5 + $0x1ec] ss:$16 sps:$4 sm:$0xff]   ;;  %v4024_v41 = vld [vmem:[#allocation5 + $0x1e0] ss:$16 sps:$4 sm:$0xff]  }
 0x105   :  { %2577 = vmatprep.subr.bf16.mxu0 %v3936_v42  ;;  %2659 = vmatprep.subr.bf16.mxu1 %v3939_v43  ;;  %v4027_v42 = vld [vmem:[#allocation5 + $0x1e8] ss:$16 sps:$4 sm:$0xff]   ;;  %v4032_v43 = vld [vmem:[#allocation5 + $0x204] ss:$16 sps:$4 sm:$0xff]  }
 0x107   :  { %1607 = vmatmul.mubr.bf16.vlgmr.msra.gmra.mrb[0].mxu0 %v3933_v44  ;;  %1771 = vmatmul.mubr.bf16.vlgmr.msra.gmra.mrb[0].mxu1 %v3933_v44  ;;  %v4035_v44 = vld [vmem:[#allocation5 + $0x20c] ss:$16 sps:$4 sm:$0xff]  }
 0x108   :  { %2578 = vmatpush1.bf16.msra.mxu0 %v3934_v45  ;;  %2660 = vmatpush1.bf16.msra.mxu1 %v3937_v46  ;;  %v286_v45 = vlaneseq }
 0x109   :  { %2579 = vmatprep.subr.bf16.mxu0 %v3942_v47  ;;  %2661 = vmatprep.subr.bf16.mxu1 %v3945_v48  ;;  %v4330_v48 = vld [vmem:[%s4474_s2] sm:$0xf] }
 0x10a   :  { %v4324_v46 = vshrl.u32 %v286_v45, 7  ;;  %v4092_v45 = vld [vmem:[#allocation5 + $0x344] ss:$16 sps:$4 sm:$0xff]  }
 0x10c   :  { %2580 = vmatpush1.bf16.msra.mxu0 %v3940_v49  ;;  %2662 = vmatpush1.bf16.msra.mxu1 %v3943_v50  ;;  %v288_v47 = vsub.s32 0, %v4324_v46  ;;  %v292_v49 = vsub.s32 1, %v4324_v46  ;;  %v300_v50 = vsub.s32 3, %v4324_v46 }
 0x10d   :  { %2581 = vmatprep.subr.bf16.mxu0 %v3948_v51  ;;  %2663 = vmatprep.subr.bf16.mxu1 %v3951_v52 }
 0x10e   :  { %v289_v51 = vrot.slane %v4330_v48, %v288_v47  ;;  %v293_v52 = vrot.slane %v4330_v48, %v292_v49 }
 0x110   :  { %2582 = vmatpush1.bf16.msra.mxu0 %v3946_v53  ;;  %2664 = vmatpush1.bf16.msra.mxu1 %v3949_v54  ;;  %v301_v53 = vrot.slane %v4330_v48, %v300_v50 }
 0x111   :  { %2583 = vmatprep.subr.bf16.mxu0 %v3954_v55  ;;  %2665 = vmatprep.subr.bf16.mxu1 %v3957_v56 }
 0x114   :  { %2584 = vmatpush1.bf16.msra.mxu0 %v3952_v57  ;;  %2666 = vmatpush1.bf16.msra.mxu1 %v3955_v58 }
 0x115   :  { %2585 = vmatprep.subr.bf16.mxu0 %v3960_v59  ;;  %2667 = vmatprep.subr.bf16.mxu1 %v3963_v60 }
 0x118   :  { %2586 = vmatpush1.bf16.msra.mxu0 %v3958_v61  ;;  %2668 = vmatpush1.bf16.msra.mxu1 %v3961_v62 }
 0x119   :  { %2587 = vmatprep.subr.bf16.mxu0 %v3966_v63  ;;  %2669 = vmatprep.subr.bf16.mxu1 %v3969_v0 }
 0x11c   :  { %2588 = vmatpush1.bf16.msra.mxu0 %v3964_v1  ;;  %2670 = vmatpush1.bf16.msra.mxu1 %v3967_v2 }
 0x11d   :  { %2589 = vmatprep.subr.bf16.mxu0 %v3972_v3  ;;  %2671 = vmatprep.subr.bf16.mxu1 %v3975_v4 }
 0x120   :  { %2590 = vmatpush1.bf16.msra.mxu0 %v3970_v5  ;;  %2672 = vmatpush1.bf16.msra.mxu1 %v3973_v6  ;;  %v4030_v5 = vld [vmem:[#allocation5 + $0x200] ss:$16 sps:$4 sm:$0xff]   ;;  %v4033_v6 = vld [vmem:[#allocation5 + $0x208] ss:$16 sps:$4 sm:$0xff]  }
 0x121   :  { %2591 = vmatprep.subr.bf16.mxu0 %v3978_v7  ;;  %2673 = vmatprep.subr.bf16.mxu1 %v3981_v8  ;;  %v4038_v8 = vld [vmem:[#allocation5 + $0x224] ss:$16 sps:$4 sm:$0xff]  }
 0x124   :  { %2592 = vmatpush1.bf16.msra.mxu0 %v3976_v9  ;;  %2674 = vmatpush1.bf16.msra.mxu1 %v3979_v10  ;;  %v4041_v9 = vld [vmem:[#allocation5 + $0x22c] ss:$16 sps:$4 sm:$0xff]  }
 0x125   :  { %2593 = vmatprep.subr.bf16.mxu0 %v3984_v12  ;;  %2675 = vmatprep.subr.bf16.mxu1 %v3987_v13  ;;  %v4036_v12 = vld [vmem:[#allocation5 + $0x220] ss:$16 sps:$4 sm:$0xff]   ;;  %v4039_v13 = vld [vmem:[#allocation5 + $0x228] ss:$16 sps:$4 sm:$0xff]  }
 0x128   :  { %2594 = vmatpush1.bf16.msra.mxu0 %v3982_v14  ;;  %2676 = vmatpush1.bf16.msra.mxu1 %v3985_v15  ;;  %v4044_v14 = vld [vmem:[#allocation5 + $0x244] ss:$16 sps:$4 sm:$0xff]   ;;  %v4047_v15 = vld [vmem:[#allocation5 + $0x24c] ss:$16 sps:$4 sm:$0xff]  }
 0x129   :  { %2595 = vmatprep.subr.bf16.mxu0 %v3990_v16  ;;  %2677 = vmatprep.subr.bf16.mxu1 %v3993_v17  ;;  %v4042_v16 = vld [vmem:[#allocation5 + $0x240] ss:$16 sps:$4 sm:$0xff]   ;;  %v4045_v17 = vld [vmem:[#allocation5 + $0x248] ss:$16 sps:$4 sm:$0xff]  }
 0x12c   :  { %2596 = vmatpush1.bf16.msra.mxu0 %v3988_v18  ;;  %2678 = vmatpush1.bf16.msra.mxu1 %v3991_v19  ;;  %v4050_v18 = vld [vmem:[#allocation5 + $0x264] ss:$16 sps:$4 sm:$0xff]   ;;  %v4053_v19 = vld [vmem:[#allocation5 + $0x26c] ss:$16 sps:$4 sm:$0xff]  }
 0x12d   :  { %2597 = vmatprep.subr.bf16.mxu0 %v3996_v20  ;;  %2679 = vmatprep.subr.bf16.mxu1 %v3999_v21  ;;  %v4048_v20 = vld [vmem:[#allocation5 + $0x260] ss:$16 sps:$4 sm:$0xff]   ;;  %v4051_v21 = vld [vmem:[#allocation5 + $0x268] ss:$16 sps:$4 sm:$0xff]  }
 0x130   :  { %2598 = vmatpush1.bf16.msra.mxu0 %v3994_v22  ;;  %2680 = vmatpush1.bf16.msra.mxu1 %v3997_v11  ;;  %v4056_v22 = vld [vmem:[#allocation5 + $0x284] ss:$16 sps:$4 sm:$0xff]   ;;  %v4059_v11 = vld [vmem:[#allocation5 + $0x28c] ss:$16 sps:$4 sm:$0xff]  }
 0x131   :  { %2599 = vmatprep.subr.bf16.mxu0 %v4002_v23  ;;  %2681 = vmatprep.subr.bf16.mxu1 %v4005_v24  ;;  %v4054_v23 = vld [vmem:[#allocation5 + $0x280] ss:$16 sps:$4 sm:$0xff]   ;;  %v4057_v24 = vld [vmem:[#allocation5 + $0x288] ss:$16 sps:$4 sm:$0xff]  }
 0x134   :  { %2600 = vmatpush1.bf16.msra.mxu0 %v4000_v25  ;;  %2682 = vmatpush1.bf16.msra.mxu1 %v4003_v26  ;;  %v4062_v25 = vld [vmem:[#allocation5 + $0x2a4] ss:$16 sps:$4 sm:$0xff]   ;;  %v4065_v26 = vld [vmem:[#allocation5 + $0x2ac] ss:$16 sps:$4 sm:$0xff]  }
 0x135   :  { %2601 = vmatprep.subr.bf16.mxu0 %v4008_v27  ;;  %2683 = vmatprep.subr.bf16.mxu1 %v4011_v28  ;;  %v4060_v27 = vld [vmem:[#allocation5 + $0x2a0] ss:$16 sps:$4 sm:$0xff]   ;;  %v4063_v28 = vld [vmem:[#allocation5 + $0x2a8] ss:$16 sps:$4 sm:$0xff]  }
 0x138   :  { %2602 = vmatpush1.bf16.msra.mxu0 %v4006_v29  ;;  %2684 = vmatpush1.bf16.msra.mxu1 %v4009_v30  ;;  %v4068_v29 = vld [vmem:[#allocation5 + $0x2c4] ss:$16 sps:$4 sm:$0xff]   ;;  %v4071_v30 = vld [vmem:[#allocation5 + $0x2cc] ss:$16 sps:$4 sm:$0xff]  }
 0x139   :  { %2603 = vmatprep.subr.bf16.mxu0 %v4014_v31  ;;  %2685 = vmatprep.subr.bf16.mxu1 %v4017_v32  ;;  %v4066_v31 = vld [vmem:[#allocation5 + $0x2c0] ss:$16 sps:$4 sm:$0xff]   ;;  %v4069_v32 = vld [vmem:[#allocation5 + $0x2c8] ss:$16 sps:$4 sm:$0xff]  }
 0x13c   :  { %2604 = vmatpush1.bf16.msra.mxu0 %v4012_v33  ;;  %2686 = vmatpush1.bf16.msra.mxu1 %v4015_v34  ;;  %v4074_v33 = vld [vmem:[#allocation5 + $0x2e4] ss:$16 sps:$4 sm:$0xff]   ;;  %v4077_v34 = vld [vmem:[#allocation5 + $0x2ec] ss:$16 sps:$4 sm:$0xff]  }
 0x13d   :  { %2605 = vmatprep.subr.bf16.mxu0 %v4020_v35  ;;  %2687 = vmatprep.subr.bf16.mxu1 %v4023_v36  ;;  %v4072_v35 = vld [vmem:[#allocation5 + $0x2e0] ss:$16 sps:$4 sm:$0xff]   ;;  %v4075_v36 = vld [vmem:[#allocation5 + $0x2e8] ss:$16 sps:$4 sm:$0xff]  }
 0x140   :  { %2606 = vmatpush1.bf16.msra.mxu0 %v4018_v37  ;;  %2688 = vmatpush1.bf16.msra.mxu1 %v4021_v38  ;;  %v4080_v37 = vld [vmem:[#allocation5 + $0x304] ss:$16 sps:$4 sm:$0xff]   ;;  %v4083_v38 = vld [vmem:[#allocation5 + $0x30c] ss:$16 sps:$4 sm:$0xff]  }
 0x141   :  { %2607 = vmatprep.subr.bf16.mxu0 %v4026_v39  ;;  %2689 = vmatprep.subr.bf16.mxu1 %v4029_v40  ;;  %v4078_v39 = vld [vmem:[#allocation5 + $0x300] ss:$16 sps:$4 sm:$0xff]   ;;  %v4081_v40 = vld [vmem:[#allocation5 + $0x308] ss:$16 sps:$4 sm:$0xff]  }
 0x144   :  { %2608 = vmatpush1.bf16.msra.mxu0 %v4024_v41  ;;  %2690 = vmatpush1.bf16.msra.mxu1 %v4027_v42  ;;  %v4086_v41 = vld [vmem:[#allocation5 + $0x324] ss:$16 sps:$4 sm:$0xff]   ;;  %v4089_v42 = vld [vmem:[#allocation5 + $0x32c] ss:$16 sps:$4 sm:$0xff]  }
 0x145   :  { %2618 = vmatprep.subr.bf16.mxu0 %v4032_v43  ;;  %2700 = vmatprep.subr.bf16.mxu1 %v4035_v44  ;;  %v4084_v43 = vld [vmem:[#allocation5 + $0x320] ss:$16 sps:$4 sm:$0xff]   ;;  %v4087_v44 = vld [vmem:[#allocation5 + $0x328] ss:$16 sps:$4 sm:$0xff]  }
 0x1da   :  { %v1608_v54 = vpop.f32.mrb[0].mxu0  ;;  %v4343_v55 = vpop.f32.mrb[0].mxu1 }
 0x1db   :  { %v3545_v56 = vadd.f32 %v1608_v54, %v289_v51  ;;  %v1610_v57 = vpop.f32.mrb[1].mxu0  ;;  %v1774_v58 = vpop.f32.mrb[1].mxu1  ;;  %v4095_v51 = vld [vmem:[#allocation5 + $0x34c] ss:$16 sps:$4 sm:$0xff]   ;;  %v4098_v54 = vld [vmem:[#allocation5 + $0x364] ss:$16 sps:$4 sm:$0xff]  }
 0x1dc   :  { %v3546_v59 = vadd.f32 %v1610_v57, %v293_v52  ;;  %v3548_v60 = vadd.f32 %v1774_v58, %v301_v53  ;;  %v1612_v61 = vpop.f32.mrb[2].mxu0  ;;  %v1776_v62 = vpop.f32.mrb[2].mxu1  ;;  %v4090_v52 = vld [vmem:[#allocation5 + $0x340] ss:$16 sps:$4 sm:$0xff]   ;;  %v4093_v53 = vld [vmem:[#allocation5 + $0x348] ss:$16 sps:$4 sm:$0xff]  }
 0x1dd   :  { %v1779_v63 = vmax.f32 %v3545_v56, 0.0  ;;  %v1613_v0 = vpop.f32.mrb[3].mxu0  ;;  %v1777_v1 = vpop.f32.mrb[3].mxu1  ;;  %v4101_v56 = vld [vmem:[#allocation5 + $0x36c] ss:$16 sps:$4 sm:$0xff]  }
 0x1de   :  { %v1780_v2 = vmax.f32 %v3546_v59, 0.0  ;;  %v1782_v3 = vmax.f32 %v3548_v60, 0.0  ;;  %v4096_v57 = vld [vmem:[#allocation5 + $0x360] ss:$16 sps:$4 sm:$0xff]   ;;  %v4099_v58 = vld [vmem:[#allocation5 + $0x368] ss:$16 sps:$4 sm:$0xff]  }
 0x1df   :  { %v1783_v7 = vpack.c.bf16 %v1779_v63, %v1779_v63  ;;  %v4104_v59 = vld [vmem:[#allocation5 + $0x384] ss:$16 sps:$4 sm:$0xff]   ;;  %v4107_v60 = vld [vmem:[#allocation5 + $0x38c] ss:$16 sps:$4 sm:$0xff]   ;;  %v4102_v61 = vld [vmem:[#allocation5 + $0x380] ss:$16 sps:$4 sm:$0xff]  }
 0x1e0   :  { %v1784_v4 = vpack.c.bf16 %v1780_v2, %v1780_v2  ;;  %v1786_v10 = vpack.c.bf16 %v1782_v3, %v1782_v3  ;;  %v4105_v62 = vld [vmem:[#allocation5 + $0x388] ss:$16 sps:$4 sm:$0xff]   ;;  %v296_v63 = vsub.s32 2, %v4324_v46  ;;  %v4110_v0 = vld [vmem:[#allocation5 + $0x3a4] ss:$16 sps:$4 sm:$0xff]  }
 0x1e1   :  { %v4113_v1 = vld [vmem:[#allocation5 + $0x3ac] ss:$16 sps:$4 sm:$0xff]   ;;  %v4108_v2 = vld [vmem:[#allocation5 + $0x3a0] ss:$16 sps:$4 sm:$0xff]   ;;  %v4111_v3 = vld [vmem:[#allocation5 + $0x3a8] ss:$16 sps:$4 sm:$0xff]  }
 0x1e2   :  { %2609 = vmatprep.mubr.bf16.mxu0 %v1784_v4  ;;  %2691 = vmatprep.mubr.bf16.mxu1 %v1784_v4  ;;  %v297_v4 = vrot.slane %v4330_v48, %v296_v63  ;;  %v4126_v48 = vld [vmem:[%s4477_s5 + $0x40] sm:$0xff]  }
 0x1e3   :  { %2610 = vmatmul.mubr.bf16.vlgmr.msra.gmra.mrb[4].mxu0 %v1783_v7  ;;  %2692 = vmatmul.mubr.bf16.vlgmr.msra.gmra.mrb[4].mxu1 %v1783_v7  ;;  %v4114_v7 = vld [vmem:[#allocation5 + $0x3c0] ss:$16 sps:$4 sm:$0xff]  }
 0x1e4   :  { %2619 = vmatpush1.bf16.msra.mxu0 %v4030_v5  ;;  %2701 = vmatpush1.bf16.msra.mxu1 %v4033_v6  ;;  %v4116_v5 = vld [vmem:[#allocation5 + $0x3c4] ss:$16 sps:$4 sm:$0xff]   ;;  %v4119_v6 = vld [vmem:[#allocation5 + $0x3cc] ss:$16 sps:$4 sm:$0xff]  }
 0x1e5   :  { %2650 = vmatprep.mubr.bf16.mxu0 %v1786_v10  ;;  %2732 = vmatprep.mubr.bf16.mxu1 %v1786_v10  ;;  %v4122_v10 = vld [vmem:[#allocation5 + $0x3e4] ss:$16 sps:$4 sm:$0xff]  }
 0x1e6   :  { %2620 = vmatprep.subr.bf16.mxu0 %v4038_v8  ;;  %2702 = vmatprep.subr.bf16.mxu1 %v4041_v9  ;;  %v4117_v8 = vld [vmem:[#allocation5 + $0x3c8] ss:$16 sps:$4 sm:$0xff]   ;;  %v3547_v9 = vadd.f32 %v4343_v55, %v297_v4  ;;  %v4128_v55 = vld [vmem:[%s4477_s5] sm:$0xff]  }
 0x1e8   :  { %2621 = vmatpush1.bf16.msra.mxu0 %v4036_v12  ;;  %2703 = vmatpush1.bf16.msra.mxu1 %v4039_v13  ;;  %v4125_v12 = vld [vmem:[#allocation5 + $0x3ec] ss:$16 sps:$4 sm:$0xff]   ;;  %v4120_v13 = vld [vmem:[#allocation5 + $0x3e0] ss:$16 sps:$4 sm:$0xff]  }
 0x1e9   :  { %2622 = vmatprep.subr.bf16.mxu0 %v4044_v14  ;;  %2704 = vmatprep.subr.bf16.mxu1 %v4047_v15  ;;  %v4123_v14 = vld [vmem:[#allocation5 + $0x3e8] ss:$16 sps:$4 sm:$0xff]   ;;  %v1781_v15 = vmax.f32 %v3547_v9, 0.0 }
 0x1ec   :  { %2623 = vmatpush1.bf16.msra.mxu0 %v4042_v16  ;;  %2705 = vmatpush1.bf16.msra.mxu1 %v4045_v17  ;;  %v4127_v16 = vld [vmem:[%s4477_s5 + $0xc0] sm:$0xff]  }
 0x1ed   :  { %2624 = vmatprep.subr.bf16.mxu0 %v4050_v18  ;;  %2706 = vmatprep.subr.bf16.mxu1 %v4053_v19  ;;  %v4129_v17 = vld [vmem:[%s4477_s5 + $0x80] sm:$0xff]   ;;  %v1785_v18 = vpack.c.bf16 %v1781_v15, %v1781_v15  ;;  %v4130_v19 = vld [vmem:[%s4477_s5 + $0x48] sm:$0xff]  }
 0x1f0   :  { %2625 = vmatpush1.bf16.msra.mxu0 %v4048_v20  ;;  %2707 = vmatpush1.bf16.msra.mxu1 %v4051_v21  ;;  %v4131_v20 = vld [vmem:[%s4477_s5 + $0xc8] sm:$0xff]  }
 0x1f1   :  { %2626 = vmatprep.subr.bf16.mxu0 %v4056_v22  ;;  %2708 = vmatprep.subr.bf16.mxu1 %v4059_v11  ;;  %v4132_v21 = vld [vmem:[%s4477_s5 + $0x8] sm:$0xff]   ;;  %v4134_v11 = vld [vmem:[%s4477_s5 + $0x50] sm:$0xff]  }
 0x1f2   :  { %v4133_v22 = vld [vmem:[%s4477_s5 + $0x88] sm:$0xff]  }
 0x1f4   :  { %2627 = vmatpush1.bf16.msra.mxu0 %v4054_v23  ;;  %2709 = vmatpush1.bf16.msra.mxu1 %v4057_v24  ;;  %v4135_v23 = vld [vmem:[%s4477_s5 + $0xd0] sm:$0xff]  }
 0x1f5   :  { %2628 = vmatprep.subr.bf16.mxu0 %v4062_v25  ;;  %2710 = vmatprep.subr.bf16.mxu1 %v4065_v26  ;;  %v4136_v24 = vld [vmem:[%s4477_s5 + $0x10] sm:$0xff]   ;;  %v4138_v26 = vld [vmem:[%s4477_s5 + $0x58] sm:$0xff]  }
 0x1f6   :  { %v4137_v25 = vld [vmem:[%s4477_s5 + $0x90] sm:$0xff]  }
 0x1f8   :  { %2629 = vmatpush1.bf16.msra.mxu0 %v4060_v27  ;;  %2711 = vmatpush1.bf16.msra.mxu1 %v4063_v28  ;;  %v4139_v27 = vld [vmem:[%s4477_s5 + $0xd8] sm:$0xff]  }
 0x1f9   :  { %2630 = vmatprep.subr.bf16.mxu0 %v4068_v29  ;;  %2712 = vmatprep.subr.bf16.mxu1 %v4071_v30  ;;  %v4140_v28 = vld [vmem:[%s4477_s5 + $0x18] sm:$0xff]   ;;  %v4142_v30 = vld [vmem:[%s4477_s5 + $0x60] sm:$0xff]  }
 0x1fa   :  { %v4141_v29 = vld [vmem:[%s4477_s5 + $0x98] sm:$0xff]  }
 0x1fc   :  { %2631 = vmatpush1.bf16.msra.mxu0 %v4066_v31  ;;  %2713 = vmatpush1.bf16.msra.mxu1 %v4069_v32  ;;  %v4143_v31 = vld [vmem:[%s4477_s5 + $0xe0] sm:$0xff]  }
 0x1fd   :  { %2632 = vmatprep.subr.bf16.mxu0 %v4074_v33  ;;  %2714 = vmatprep.subr.bf16.mxu1 %v4077_v34  ;;  %v4144_v32 = vld [vmem:[%s4477_s5 + $0x20] sm:$0xff]   ;;  %v4146_v34 = vld [vmem:[%s4477_s5 + $0x68] sm:$0xff]  }
 0x1fe   :  { %v4145_v33 = vld [vmem:[%s4477_s5 + $0xa0] sm:$0xff]  }
 0x200   :  { %2633 = vmatpush1.bf16.msra.mxu0 %v4072_v35  ;;  %2715 = vmatpush1.bf16.msra.mxu1 %v4075_v36  ;;  %v4147_v35 = vld [vmem:[%s4477_s5 + $0xe8] sm:$0xff]  }
 0x201   :  { %2634 = vmatprep.subr.bf16.mxu0 %v4080_v37  ;;  %2716 = vmatprep.subr.bf16.mxu1 %v4083_v38  ;;  %v4148_v36 = vld [vmem:[%s4477_s5 + $0x28] sm:$0xff]   ;;  %v4150_v38 = vld [vmem:[%s4477_s5 + $0x70] sm:$0xff]  }
 0x202   :  { %v4149_v37 = vld [vmem:[%s4477_s5 + $0xa8] sm:$0xff]  }
 0x204   :  { %2635 = vmatpush1.bf16.msra.mxu0 %v4078_v39  ;;  %2717 = vmatpush1.bf16.msra.mxu1 %v4081_v40  ;;  %v4151_v39 = vld [vmem:[%s4477_s5 + $0xf0] sm:$0xff]  }
 0x205   :  { %2636 = vmatprep.subr.bf16.mxu0 %v4086_v41  ;;  %2718 = vmatprep.subr.bf16.mxu1 %v4089_v42  ;;  %v4152_v40 = vld [vmem:[%s4477_s5 + $0x30] sm:$0xff]   ;;  %v4154_v42 = vld [vmem:[%s4477_s5 + $0x78] sm:$0xff]  }
 0x206   :  { %v4153_v41 = vld [vmem:[%s4477_s5 + $0xb0] sm:$0xff]  }
 0x208   :  { %2637 = vmatpush1.bf16.msra.mxu0 %v4084_v43  ;;  %2719 = vmatpush1.bf16.msra.mxu1 %v4087_v44  ;;  %v4155_v43 = vld [vmem:[%s4477_s5 + $0xf8] sm:$0xff]  }
 0x209   :  { %2638 = vmatprep.subr.bf16.mxu0 %v4092_v45  ;;  %2720 = vmatprep.subr.bf16.mxu1 %v4095_v51  ;;  %v4156_v44 = vld [vmem:[%s4477_s5 + $0x38] sm:$0xff]   ;;  %v1915_v51 = vld [vmem:[%s4476_s4] sm:$0xf] }
 0x20a   :  { %v4157_v45 = vld [vmem:[%s4477_s5 + $0xb8] sm:$0xff]  }
 0x20c   :  { %2639 = vmatpush1.bf16.msra.mxu0 %v4090_v52  ;;  %2721 = vmatpush1.bf16.msra.mxu1 %v4093_v53  ;;  %v1920_v52 = vrot.slane %v1915_v51, %v288_v47  ;;  %v1928_v53 = vrot.slane %v1915_v51, %v296_v63 }
 0x20d   :  { %2640 = vmatprep.subr.bf16.mxu0 %v4098_v54  ;;  %2722 = vmatprep.subr.bf16.mxu1 %v4101_v56  ;;  %v1924_v54 = vrot.slane %v1915_v51, %v292_v49  ;;  %v1932_v56 = vrot.slane %v1915_v51, %v300_v50 }
 0x210   :  { %2641 = vmatpush1.bf16.msra.mxu0 %v4096_v57  ;;  %2723 = vmatpush1.bf16.msra.mxu1 %v4099_v58 }
 0x211   :  { %2642 = vmatprep.subr.bf16.mxu0 %v4104_v59  ;;  %2724 = vmatprep.subr.bf16.mxu1 %v4107_v60 }
 0x214   :  { %2643 = vmatpush1.bf16.msra.mxu0 %v4102_v61  ;;  %2725 = vmatpush1.bf16.msra.mxu1 %v4105_v62 }
 0x215   :  { %2644 = vmatprep.subr.bf16.mxu0 %v4110_v0  ;;  %2726 = vmatprep.subr.bf16.mxu1 %v4113_v1 }
 0x218   :  { %2645 = vmatpush1.bf16.msra.mxu0 %v4108_v2  ;;  %2727 = vmatpush1.bf16.msra.mxu1 %v4111_v3 }
 0x219   :  { %2646 = vmatprep.subr.bf16.mxu0 %v4116_v5  ;;  %2728 = vmatprep.subr.bf16.mxu1 %v4119_v6 }
 0x21c   :  { %2647 = vmatpush1.bf16.msra.mxu0 %v4114_v7  ;;  %2729 = vmatpush1.bf16.msra.mxu1 %v4117_v8 }
 0x21d   :  { %2648 = vmatprep.subr.bf16.mxu0 %v4122_v10  ;;  %2730 = vmatprep.subr.bf16.mxu1 %v4125_v12  ;;  %v3468_v12 = vld [vmem:[%s4478_s6] ss:$0 sm:$0xff] }
 0x220   :  { %2649 = vmatpush1.bf16.msra.mxu0 %v4120_v13  ;;  %2731 = vmatpush1.bf16.msra.mxu1 %v4123_v14 }
 0x221   :  { %3501 = vmatprep.subr.bf16.mxu0 %v4126_v48  ;;  %3523 = vmatprep.subr.bf16.mxu1 %v4127_v16 }
 0x223   :  { %2651 = vmatmul.mubr.bf16.vlgmr.msra.gmra.mrb[4].mxu0 %v1785_v18  ;;  %2733 = vmatmul.mubr.bf16.vlgmr.msra.gmra.mrb[4].mxu1 %v1785_v18 }
 0x224   :  { %3502 = vmatpush3.bf16.msra.mxu0 %v4128_v55  ;;  %3524 = vmatpush3.bf16.msra.mxu1 %v4129_v17 }
 0x225   :  { %3503 = vmatprep.subr.bf16.mxu0 %v4130_v19  ;;  %3525 = vmatprep.subr.bf16.mxu1 %v4131_v20 }
 0x228   :  { %3504 = vmatpush3.bf16.msra.mxu0 %v4132_v21  ;;  %3526 = vmatpush3.bf16.msra.mxu1 %v4133_v22 }
 0x229   :  { %3505 = vmatprep.subr.bf16.mxu0 %v4134_v11  ;;  %3527 = vmatprep.subr.bf16.mxu1 %v4135_v23 }
 0x22c   :  { %3506 = vmatpush3.bf16.msra.mxu0 %v4136_v24  ;;  %3528 = vmatpush3.bf16.msra.mxu1 %v4137_v25 }
 0x22d   :  { %3507 = vmatprep.subr.bf16.mxu0 %v4138_v26  ;;  %3529 = vmatprep.subr.bf16.mxu1 %v4139_v27 }
 0x230   :  { %3508 = vmatpush3.bf16.msra.mxu0 %v4140_v28  ;;  %3530 = vmatpush3.bf16.msra.mxu1 %v4141_v29 }
 0x231   :  { %3509 = vmatprep.subr.bf16.mxu0 %v4142_v30  ;;  %3531 = vmatprep.subr.bf16.mxu1 %v4143_v31 }
 0x234   :  { %3510 = vmatpush3.bf16.msra.mxu0 %v4144_v32  ;;  %3532 = vmatpush3.bf16.msra.mxu1 %v4145_v33 }
 0x235   :  { %3511 = vmatprep.subr.bf16.mxu0 %v4146_v34  ;;  %3533 = vmatprep.subr.bf16.mxu1 %v4147_v35 }
 0x238   :  { %3512 = vmatpush3.bf16.msra.mxu0 %v4148_v36  ;;  %3534 = vmatpush3.bf16.msra.mxu1 %v4149_v37 }
 0x239   :  { %3513 = vmatprep.subr.bf16.mxu0 %v4150_v38  ;;  %3535 = vmatprep.subr.bf16.mxu1 %v4151_v39 }
 0x23c   :  { %3514 = vmatpush3.bf16.msra.mxu0 %v4152_v40  ;;  %3536 = vmatpush3.bf16.msra.mxu1 %v4153_v41 }
 0x23d   :  { %3515 = vmatprep.subr.bf16.mxu0 %v4154_v42  ;;  %3537 = vmatprep.subr.bf16.mxu1 %v4155_v43 }
 0x240   :  { %3516 = vmatpush3.bf16.msra.mxu0 %v4156_v44  ;;  %3538 = vmatpush3.bf16.msra.mxu1 %v4157_v45 }
 0x2f6   :  { %v2652_v57 = vpop.f32.mrb[4].mxu0  ;;  %v2734_v58 = vpop.f32.mrb[4].mxu1 }
 0x2f7   :  { %v3549_v59 = vadd.f32 %v2652_v57, %v1920_v52  ;;  %v3551_v60 = vadd.f32 %v2734_v58, %v1928_v53  ;;  %v2654_v61 = vpop.f32.mrb[5].mxu0  ;;  %v2736_v62 = vpop.f32.mrb[5].mxu1 }
 0x2f8   :  { %v3550_v0 = vadd.f32 %v2654_v61, %v1924_v54  ;;  %v3552_v1 = vadd.f32 %v2736_v62, %v1932_v56  ;;  %v2656_v2 = vpop.f32.mrb[6].mxu0  ;;  %v2738_v3 = vpop.f32.mrb[6].mxu1 }
 0x2f9   :  { %v2741_v47 = vmax.f32 %v3549_v59, 0.0  ;;  %v2743_v4 = vmax.f32 %v3551_v60, 0.0  ;;  %v2657_v5 = vpop.f32.mrb[7].mxu0  ;;  %v2739_v63 = vpop.f32.mrb[7].mxu1 }
 0x2fa   :  { %v2742_v6 = vmax.f32 %v3550_v0, 0.0  ;;  %v2744_v7 = vmax.f32 %v3552_v1, 0.0 }
 0x2fb   :  { %v2745_v46 = vpack.c.bf16 %v2741_v47, %v2741_v47  ;;  %v2747_v50 = vpack.c.bf16 %v2743_v4, %v2743_v4 }
 0x2fc   :  { %v2746_v49 = vpack.c.bf16 %v2742_v6, %v2742_v6  ;;  %v2748_v8 = vpack.c.bf16 %v2744_v7, %v2744_v7 }
 0x2fe   :  { %3044 = vmatprep.mubr.bf16.mxu0 %v2746_v49  ;;  %3084 = vmatprep.mubr.bf16.mxu1 %v2748_v8 }
 0x2ff   :  { %3045 = vmatmul.mubr.bf16.vlgmr.msra.gmra.mrb[8].mxu0 %v2745_v46  ;;  %3085 = vmatmul.mubr.bf16.vlgmr.msra.gmra.mrb[8].mxu1 %v2747_v50 }
 0x3d2   :  { %v3517_v9 = vpop.f32.mrb[8].mxu0  ;;  %v3539_v10 = vpop.f32.mrb[8].mxu1 }
 0x3d3   :  { %v3518_v13 = vpop.f32.mrb[9].mxu0  ;;  %v3540_v14 = vpop.f32.mrb[9].mxu1 }
 0x3d4   :  { %v3519_v15 = vadd.f32 %v3518_v13, %v3517_v9  ;;  %v3541_v48 = vadd.f32 %v3540_v14, %v3539_v10  ;;  %v3520_v16 = vpop.f32.mrb[10].mxu0  ;;  %v3542_v55 = vpop.f32.mrb[10].mxu1 }
 0x3d5   :  { %v3521_v17 = vpop.f32.mrb[11].mxu0  ;;  %v3543_v18 = vpop.f32.mrb[11].mxu1 }
 0x3d6   :  { %v3047_v19 = vadd.f32 %v3519_v15, %v3468_v12 }
 0x3d8   :  { %v3087_v20 = vadd.f32 %v3541_v48, %v3047_v19 }
 0x3da   :  { %3092 = vst [vmem:[#allocation7] sm:$0xff] %v3087_v20 }
 0x3db   :  { %4213 = shalt.err (!%p4210_p6)
}
 0x3dc   :  { %s4214_s25 = scalar_lea.hbm %s4479_s7, 128 }
 0x3dd   :  { %p4215_p7 = scmp.ne.s32.totalorder %s4479_s7, %s4214_s25  ;;  %p4218_p8 = scmp.lt.u32.totalorder %s4214_s25, %s4479_s7 }
 0x3df   :  { %p4220_p9 = pnand %p4218_p8, %p4215_p7 }
 0x3e1   :  { %4223 = shalt.err (!%p4220_p9)
}
 0x3e2   :  { %3102 = dma.vmem_to_hbm [thread:$0]  %s3100_s23, 128, %s4479_s7, [#allocation4]  }
 0x3e3   :  { %4228 = dma.done.wait [#allocation4], 128  }
 0x3e4   :  { %4229 = vsyncadd [#allocation4], 4294967168 }
 0x3e5   :  { %3106 = vsyncpa [#allocation3], 1 }
 0x3e6   :  { %3107 = vsyncpa [#allocation6], 1 }
 0x3e7   :  { %3108 = vsyncpa [#allocation4], 1 }

</bundles_post_ra>
